<compile_context>
chip_gen: v5e
topology: v5e:2x2
jax: 0.10.0
libtpu: 0.0.40
codegen_flags: <defaults>
</compile_context>

<pallas_src>
import jax
import jax.numpy as jnp
from jax.experimental import pallas as pl
from jax.experimental.pallas import tpu as pltpu

# ----------------------------- model dimensions ------------------------------
B = 8      # batch
T = 8      # time steps from the transcription network
E = 32     # prediction-network embedding dim
H = 32     # prediction-network LSTM hidden dim
D = 32     # joint dim (TN output dim == PN output dim)
V = 128    # vocab size (len(tgt_dict))

BLANK_ID = V - 1                 # blank_id = len(tgt_dict) + (-1)
INITIAL_TOKEN_ID = BLANK_ID      # initial_token_id defaults to blank_id
OUT_LANES = 128                  # lane-dense output width (unmasked vst)

_VMEM = pl.BlockSpec(memory_space=pltpu.MemorySpace.VMEM)


# ------------------------------ fused kernel body -----------------------------
def _greedy_decode_kernel(tn_ref, emb_wih_ref, w_hh_ref, b_lstm_ref,
                          w_po_ref, b_po_ref, w_j_ref, b_j_ref,
                          pn0_ref, h0_ref, c0_ref,
                          preds_ref, scores_ref):
    """Fully fused greedy transducer decode.

    tn:[B,T*D] f32   emb_wih:[V,4H] bf16   w_hh:[H,4H] bf16   b_lstm:[1,4H] f32
    w_po:[H,D] bf16  b_po:[1,D] f32        w_j:[D,V] f32      b_j:[1,V] f32
    pn0:[1,D] f32    h0:[1,H] f32          c0:[1,H] f32
    outputs: preds:[B,128] int32 (-1 == no emission, lanes >= T unused),
             scores:[B,128] f32 (score broadcast across lanes)
    """
    emb_wih = emb_wih_ref[...]
    w_hh = w_hh_ref[...]
    b_lstm = b_lstm_ref[...]
    w_po = w_po_ref[...]
    b_po = b_po_ref[...]
    w_j = w_j_ref[...]
    b_j = b_j_ref[...]

    lane_v = jax.lax.broadcasted_iota(jnp.int32, (B, V), 1)          # vocab lane index
    lane_p = jax.lax.broadcasted_iota(jnp.int32, (B, OUT_LANES), 1)  # preds lane index

    # Prologue (hidden=None, token=INITIAL_TOKEN_ID) is a weight-only constant — precomputed
    # in the wrapper; no matmuls before the loop.
    onehot = (lane_v == INITIAL_TOKEN_ID).astype(jnp.bfloat16)       # [B, V] last-token one-hot
    pn = jnp.broadcast_to(pn0_ref[...], (B, D))
    h = jnp.broadcast_to(h0_ref[...], (B, H))
    c = jnp.broadcast_to(c0_ref[...], (B, H))

    scores = jnp.zeros((B, 1), jnp.float32)
    preds = jnp.full((B, OUT_LANES), -1, jnp.int32)

    # ---- greedy decode loop, fully unrolled (T is small & static) ----
    for t in range(T):
        h_tn = tn_ref[:, t * D:(t + 1) * D]                           # static lane-offset load
        joined = jnp.maximum(h_tn + pn, 0.0)
        # joint matmul kept in f32 for score/argmax parity with the reference
        logits = jnp.dot(joined, w_j, preferred_element_type=jnp.float32) + b_j   # [B, V]

        m = jnp.max(logits, axis=-1, keepdims=True)                    # [B, 1]
        # Both reductions below depend only on m → they overlap on the 2 XLUs.
        sum_exp = jnp.sum(jnp.exp(logits - m), axis=-1, keepdims=True)
        positions = jnp.min(jnp.where(logits >= m, lane_v, V),
                            axis=-1, keepdims=True).astype(jnp.int32)  # lowest-index argmax
        logp_target = -jnp.log(sum_exp)                                # == m - lse == max log-softmax

        mask = positions != BLANK_ID                                   # [B, 1] emitted?
        scores = scores + jnp.where(mask, logp_target, 0.0)
        step_pred = jnp.where(mask, positions, -1)                     # [B, 1]
        preds = jnp.where(lane_p == t, step_pred, preds)               # write column t

        # update last-token one-hot only for utterances that emitted a symbol
        new_onehot = (lane_v == positions).astype(jnp.bfloat16)
        onehot = jnp.where(mask, new_onehot, onehot)

        # PN LSTM step: embedding folded into the input projection; two independent bf16
        # MXU matmuls with f32 accumulation.
        gates = (jnp.dot(onehot, emb_wih, preferred_element_type=jnp.float32)
                 + jnp.dot(h.astype(jnp.bfloat16), w_hh, preferred_element_type=jnp.float32)
                 + b_lstm)                                             # [B, 4H] f32
        # full-vreg EUP ops, then lane-slice (PyTorch gate order: i, f, g, o)
        sig = 0.5 * (jnp.tanh(0.5 * gates) + 1.0)                      # sigmoid of all gates
        tnh = jnp.tanh(gates)
        i_g = sig[:, 0 * H:1 * H]
        f_g = sig[:, 1 * H:2 * H]
        g_g = tnh[:, 2 * H:3 * H]
        o_g = sig[:, 3 * H:4 * H]
        c_new = f_g * c + i_g * g_g
        h_new = o_g * jnp.tanh(c_new)
        pn_new = jnp.dot(h_new.astype(jnp.bfloat16), w_po,
                         preferred_element_type=jnp.float32) + b_po    # [B, D]

        # masked (exact 0/1 select) update == per-item update in the reference
        pn = jnp.where(mask, pn_new, pn)
        h = jnp.where(mask, h_new, h)
        c = jnp.where(mask, c_new, c)

    # single lane-dense (unmasked) store at the end
    preds_ref[...] = preds
    scores_ref[...] = jnp.broadcast_to(scores, (B, OUT_LANES))


# ------------------------------- kernel wrapper --------------------------------
def transducer_greedy_decode(tn_output, params):
    """JAX equivalent of TransducerBeamSearcherforFairseq.transducer_greedy_decode
    (the searcher used when beam_size <= 1), as a single fused Pallas call."""
    # ---- one-time (per call) weight folding & prologue precompute ----
    emb_wih = params["embedding"] @ params["w_ih"]                      # [V, 4H]
    # PyTorch nn.LSTM carries two biases; fold b_ih + b_hh into one gate bias.
    b_lstm = params["b_ih"] + params["b_hh"]                            # [1, 4H]

    # prologue PN step with h=c=0 and constant initial token (no matmuls left in-kernel)
    gates0 = emb_wih[INITIAL_TOKEN_ID:INITIAL_TOKEN_ID + 1, :] + b_lstm  # [1, 4H]
    i0 = jax.nn.sigmoid(gates0[:, 0 * H:1 * H])
    g0 = jnp.tanh(gates0[:, 2 * H:3 * H])
    o0 = jax.nn.sigmoid(gates0[:, 3 * H:4 * H])
    c0 = i0 * g0                                                         # f*0 + i*g
    h0 = o0 * jnp.tanh(c0)
    pn0 = h0 @ params["w_pn_out"] + params["b_pn_out"]                   # [1, D]

    # lane-dense TN layout: [B, T*D] with static per-step lane offsets
    tn_flat = tn_output.reshape(B, T * D)

    preds_pad, scores_pad = pl.pallas_call(
        _greedy_decode_kernel,
        out_shape=(
            jax.ShapeDtypeStruct((B, OUT_LANES), jnp.int32),
            jax.ShapeDtypeStruct((B, OUT_LANES), jnp.float32),
        ),
        in_specs=[_VMEM] * 11,
        out_specs=(_VMEM, _VMEM),
    )(tn_flat,
      emb_wih.astype(jnp.bfloat16),
      params["w_hh"].astype(jnp.bfloat16),
      b_lstm,
      params["w_pn_out"].astype(jnp.bfloat16),
      params["b_pn_out"],
      params["w_joint"],
      params["b_joint"],
      pn0, h0, c0)

    preds = preds_pad[:, :T]                       # [B, T] (-1 == no emission)
    scores = scores_pad[:, 0]                      # [B]
    mean_exp_score = jnp.mean(jnp.exp(scores))     # torch.Tensor(logp_scores).exp().mean()
    return preds, mean_exp_score


@jax.jit
def forward(tn_output, params):
    """Mirrors TransducerBeamSearcherforFairseq.forward with beam_size=1 (greedy)."""
    preds, mean_exp_score = transducer_greedy_decode(tn_output, params)
    return preds, mean_exp_score


# --------------------------- deterministic parameters --------------------------
def init_params(key):
    ks = jax.random.split(key, 9)
    s = 0.1
    return {
        "embedding": jax.random.normal(ks[0], (V, E), jnp.float32) * s,
        "w_ih":      jax.random.normal(ks[1], (E, 4 * H), jnp.float32) * s,
        "w_hh":      jax.random.normal(ks[2], (H, 4 * H), jnp.float32) * s,
        # Two LSTM biases as in PyTorch nn.LSTM (folded to b_ih + b_hh before the kernel).
        "b_ih":      jax.random.normal(ks[3], (1, 4 * H), jnp.float32) * s,
        "b_hh":      jax.random.normal(ks[4], (1, 4 * H), jnp.float32) * s,
        "w_pn_out":  jax.random.normal(ks[5], (H, D), jnp.float32) * s,
        "b_pn_out":  jnp.zeros((1, D), jnp.float32),
        "w_joint":   jax.random.normal(ks[6], (D, V), jnp.float32) * s,
        "b_joint":   jax.random.normal(ks[7], (1, V), jnp.float32) * s,
    }


# ------------------------------------ main --------------------------------------
if __name__ == "__main__":
    key = jax.random.PRNGKey(0)
    k_par, k_in = jax.random.split(key)
    params = init_params(k_par)

    # tn_output: [batch, time_len, hiddens]
    tn_output = jax.random.normal(k_in, (B, T, D), jnp.float32)

    preds, mean_exp_score = forward(tn_output, params)
    preds = jax.block_until_ready(preds)
    mean_exp_score = jax.block_until_ready(mean_exp_score)

    # Convert padded per-step predictions into the module's list-of-lists form.
    preds_host = jax.device_get(preds)
    hyp_prediction = [[int(tok) for tok in row if tok >= 0] for row in preds_host]
    result = (hyp_prediction, float(jax.device_get(mean_exp_score)), None, None)
    _ = result

    print("KERNEL_OK")
</pallas_src>

<mosaic_0001>
module attributes {stable_mosaic.version = 11 : i64} {
  func.func @_greedy_decode_kernel(%arg0: memref<8x256xf32, #tpu.memory_space<vmem>>, %arg1: memref<128x128xbf16, #tpu.memory_space<vmem>>, %arg2: memref<32x128xbf16, #tpu.memory_space<vmem>>, %arg3: memref<1x128xf32, #tpu.memory_space<vmem>>, %arg4: memref<32x32xbf16, #tpu.memory_space<vmem>>, %arg5: memref<1x32xf32, #tpu.memory_space<vmem>>, %arg6: memref<32x128xf32, #tpu.memory_space<vmem>>, %arg7: memref<1x128xf32, #tpu.memory_space<vmem>>, %arg8: memref<1x32xf32, #tpu.memory_space<vmem>>, %arg9: memref<1x32xf32, #tpu.memory_space<vmem>>, %arg10: memref<1x32xf32, #tpu.memory_space<vmem>>, %arg11: memref<8x128xi32, #tpu.memory_space<vmem>>, %arg12: memref<8x128xf32, #tpu.memory_space<vmem>>) attributes {dimension_semantics = [], scalar_prefetch = 0 : i64, scratch_operands = 0 : i64, tpu.core_type = #tpu.core_type<tc>} {
    %c0 = arith.constant 0 : index
    %c0_0 = arith.constant 0 : index
    %0 = vector.load %arg1[%c0, %c0_0] : memref<128x128xbf16, #tpu.memory_space<vmem>>, vector<128x128xbf16>
    %c0_1 = arith.constant 0 : index
    %c0_2 = arith.constant 0 : index
    %1 = vector.load %arg2[%c0_1, %c0_2] : memref<32x128xbf16, #tpu.memory_space<vmem>>, vector<32x128xbf16>
    %c0_3 = arith.constant 0 : index
    %c0_4 = arith.constant 0 : index
    %2 = vector.load %arg3[%c0_3, %c0_4] : memref<1x128xf32, #tpu.memory_space<vmem>>, vector<1x128xf32>
    %c0_5 = arith.constant 0 : index
    %c0_6 = arith.constant 0 : index
    %3 = vector.load %arg4[%c0_5, %c0_6] : memref<32x32xbf16, #tpu.memory_space<vmem>>, vector<32x32xbf16>
    %c0_7 = arith.constant 0 : index
    %c0_8 = arith.constant 0 : index
    %4 = vector.load %arg5[%c0_7, %c0_8] : memref<1x32xf32, #tpu.memory_space<vmem>>, vector<1x32xf32>
    %c0_9 = arith.constant 0 : index
    %c0_10 = arith.constant 0 : index
    %5 = vector.load %arg6[%c0_9, %c0_10] : memref<32x128xf32, #tpu.memory_space<vmem>>, vector<32x128xf32>
    %c0_11 = arith.constant 0 : index
    %c0_12 = arith.constant 0 : index
    %6 = vector.load %arg7[%c0_11, %c0_12] : memref<1x128xf32, #tpu.memory_space<vmem>>, vector<1x128xf32>
    %7 = tpu.iota {dimensions = array<i32: 1>} : vector<8x128xi32>
    %8 = tpu.iota {dimensions = array<i32: 1>} : vector<8x128xi32>
    %c127_i32 = arith.constant 127 : i32
    %9 = vector.broadcast %c127_i32 : i32 to vector<8x128xi32>
    %10 = arith.cmpi eq, %7, %9 : vector<8x128xi32>
    %11 = arith.extui %10 : vector<8x128xi1> to vector<8x128xi32>
    %12 = arith.sitofp %11 : vector<8x128xi32> to vector<8x128xf32>
    %13 = arith.truncf %12 : vector<8x128xf32> to vector<8x128xbf16>
    %c0_13 = arith.constant 0 : index
    %c0_14 = arith.constant 0 : index
    %14 = vector.load %arg8[%c0_13, %c0_14] : memref<1x32xf32, #tpu.memory_space<vmem>>, vector<1x32xf32>
    %15 = vector.shape_cast %14 : vector<1x32xf32> to vector<1x32xf32>
    %16 = vector.broadcast %15 : vector<1x32xf32> to vector<8x32xf32>
    %c0_15 = arith.constant 0 : index
    %c0_16 = arith.constant 0 : index
    %17 = vector.load %arg9[%c0_15, %c0_16] : memref<1x32xf32, #tpu.memory_space<vmem>>, vector<1x32xf32>
    %18 = vector.shape_cast %17 : vector<1x32xf32> to vector<1x32xf32>
    %19 = vector.broadcast %18 : vector<1x32xf32> to vector<8x32xf32>
    %c0_17 = arith.constant 0 : index
    %c0_18 = arith.constant 0 : index
    %20 = vector.load %arg10[%c0_17, %c0_18] : memref<1x32xf32, #tpu.memory_space<vmem>>, vector<1x32xf32>
    %21 = vector.shape_cast %20 : vector<1x32xf32> to vector<1x32xf32>
    %22 = vector.broadcast %21 : vector<1x32xf32> to vector<8x32xf32>
    %cst = arith.constant 0.000000e+00 : f32
    %23 = vector.broadcast %cst : f32 to vector<8x1xf32>
    %c-1_i32 = arith.constant -1 : i32
    %24 = vector.broadcast %c-1_i32 : i32 to vector<8x128xi32>
    %c0_19 = arith.constant 0 : index
    %c0_20 = arith.constant 0 : index
    %25 = vector.load %arg0[%c0_19, %c0_20] : memref<8x256xf32, #tpu.memory_space<vmem>>, vector<8x32xf32>
    %26 = arith.addf %25, %16 : vector<8x32xf32>
    %cst_21 = arith.constant 0.000000e+00 : f32
    %27 = vector.broadcast %cst_21 : f32 to vector<8x32xf32>
    %28 = arith.maximumf %26, %27 : vector<8x32xf32>
    %cst_22 = arith.constant dense<0.000000e+00> : vector<8x128xf32>
    %29 = tpu.matmul %28, %5, %cst_22 {dimension_numbers = #tpu.dot_dimension_numbers<[1], [0], [0], [1], [0, 0, 1, 1], [], []>} : vector<8x32xf32>, vector<32x128xf32>, vector<8x128xf32> -> vector<8x128xf32>
    %30 = vector.broadcast %6 : vector<1x128xf32> to vector<8x128xf32>
    %31 = arith.addf %29, %30 : vector<8x128xf32>
    %cst_23 = arith.constant dense<0xFF800000> : vector<8xf32>
    %32 = vector.multi_reduction <maximumf>, %31, %cst_23 [1] : vector<8x128xf32> to vector<8xf32>
    %33 = vector.shape_cast %32 : vector<8xf32> to vector<8x1xf32>
    %34 = vector.broadcast %33 : vector<8x1xf32> to vector<8x128xf32>
    %35 = arith.subf %31, %34 : vector<8x128xf32>
    %36 = math.exp %35 : vector<8x128xf32>
    %cst_24 = arith.constant dense<0.000000e+00> : vector<8xf32>
    %37 = vector.multi_reduction <add>, %36, %cst_24 [1] : vector<8x128xf32> to vector<8xf32>
    %38 = vector.shape_cast %37 : vector<8xf32> to vector<8x1xf32>
    %39 = vector.broadcast %33 : vector<8x1xf32> to vector<8x128xf32>
    %40 = arith.cmpf oge, %31, %39 : vector<8x128xf32>
    %c128_i32 = arith.constant 128 : i32
    %41 = vector.broadcast %c128_i32 : i32 to vector<8x128xi32>
    %42 = arith.select %40, %7, %41 : vector<8x128xi1>, vector<8x128xi32>
    %cst_25 = arith.constant dense<2147483647> : vector<8xi32>
    %43 = vector.multi_reduction <minsi>, %42, %cst_25 [1] : vector<8x128xi32> to vector<8xi32>
    %44 = vector.shape_cast %43 : vector<8xi32> to vector<8x1xi32>
    %45 = math.log %38 : vector<8x1xf32>
    %cst_26 = arith.constant 0.000000e+00 : f32
    %46 = vector.broadcast %cst_26 : f32 to vector<8x1xf32>
    %47 = arith.subf %46, %45 : vector<8x1xf32>
    %c127_i32_27 = arith.constant 127 : i32
    %48 = vector.broadcast %c127_i32_27 : i32 to vector<8x1xi32>
    %49 = arith.cmpi ne, %44, %48 : vector<8x1xi32>
    %cst_28 = arith.constant 0.000000e+00 : f32
    %50 = vector.broadcast %cst_28 : f32 to vector<8x1xf32>
    %51 = arith.select %49, %47, %50 : vector<8x1xi1>, vector<8x1xf32>
    %52 = arith.addf %23, %51 : vector<8x1xf32>
    %c-1_i32_29 = arith.constant -1 : i32
    %53 = vector.broadcast %c-1_i32_29 : i32 to vector<8x1xi32>
    %54 = arith.select %49, %44, %53 : vector<8x1xi1>, vector<8x1xi32>
    %c0_i32 = arith.constant 0 : i32
    %55 = vector.broadcast %c0_i32 : i32 to vector<8x128xi32>
    %56 = arith.cmpi eq, %8, %55 : vector<8x128xi32>
    %57 = vector.shape_cast %54 : vector<8x1xi32> to vector<8x1xi32>
    %58 = vector.broadcast %57 : vector<8x1xi32> to vector<8x128xi32>
    %59 = arith.select %56, %58, %24 : vector<8x128xi1>, vector<8x128xi32>
    %60 = vector.broadcast %44 : vector<8x1xi32> to vector<8x128xi32>
    %61 = arith.cmpi eq, %7, %60 : vector<8x128xi32>
    %62 = arith.extui %61 : vector<8x128xi1> to vector<8x128xi32>
    %63 = arith.sitofp %62 : vector<8x128xi32> to vector<8x128xf32>
    %64 = arith.truncf %63 : vector<8x128xf32> to vector<8x128xbf16>
    %65 = vector.shape_cast %49 : vector<8x1xi1> to vector<8x1xi1>
    %66 = vector.broadcast %65 : vector<8x1xi1> to vector<8x128xi1>
    %67 = arith.select %66, %64, %13 : vector<8x128xi1>, vector<8x128xbf16>
    %cst_30 = arith.constant dense<0.000000e+00> : vector<8x128xf32>
    %68 = tpu.matmul %67, %0, %cst_30 {dimension_numbers = #tpu.dot_dimension_numbers<[1], [0], [0], [1], [0, 0, 1, 1], [], []>} : vector<8x128xbf16>, vector<128x128xbf16>, vector<8x128xf32> -> vector<8x128xf32>
    %69 = arith.truncf %19 : vector<8x32xf32> to vector<8x32xbf16>
    %cst_31 = arith.constant dense<0.000000e+00> : vector<8x128xf32>
    %70 = tpu.matmul %69, %1, %cst_31 {dimension_numbers = #tpu.dot_dimension_numbers<[1], [0], [0], [1], [0, 0, 1, 1], [], []>} : vector<8x32xbf16>, vector<32x128xbf16>, vector<8x128xf32> -> vector<8x128xf32>
    %71 = arith.addf %68, %70 : vector<8x128xf32>
    %72 = vector.broadcast %2 : vector<1x128xf32> to vector<8x128xf32>
    %73 = arith.addf %71, %72 : vector<8x128xf32>
    %cst_32 = arith.constant 5.000000e-01 : f32
    %74 = vector.broadcast %cst_32 : f32 to vector<8x128xf32>
    %75 = arith.mulf %74, %73 : vector<8x128xf32>
    %76 = math.tanh %75 : vector<8x128xf32>
    %cst_33 = arith.constant 1.000000e+00 : f32
    %77 = vector.broadcast %cst_33 : f32 to vector<8x128xf32>
    %78 = arith.addf %76, %77 : vector<8x128xf32>
    %cst_34 = arith.constant 5.000000e-01 : f32
    %79 = vector.broadcast %cst_34 : f32 to vector<8x128xf32>
    %80 = arith.mulf %79, %78 : vector<8x128xf32>
    %81 = math.tanh %73 : vector<8x128xf32>
    %82 = vector.extract_strided_slice %80 {offsets = [0, 0], sizes = [8, 32], strides = [1, 1]} : vector<8x128xf32> to vector<8x32xf32>
    %83 = vector.extract_strided_slice %80 {offsets = [0, 32], sizes = [8, 32], strides = [1, 1]} : vector<8x128xf32> to vector<8x32xf32>
    %84 = vector.extract_strided_slice %81 {offsets = [0, 64], sizes = [8, 32], strides = [1, 1]} : vector<8x128xf32> to vector<8x32xf32>
    %85 = vector.extract_strided_slice %80 {offsets = [0, 96], sizes = [8, 32], strides = [1, 1]} : vector<8x128xf32> to vector<8x32xf32>
    %86 = arith.mulf %83, %22 : vector<8x32xf32>
    %87 = arith.mulf %82, %84 : vector<8x32xf32>
    %88 = arith.addf %86, %87 : vector<8x32xf32>
    %89 = math.tanh %88 : vector<8x32xf32>
    %90 = arith.mulf %85, %89 : vector<8x32xf32>
    %91 = arith.truncf %90 : vector<8x32xf32> to vector<8x32xbf16>
    %cst_35 = arith.constant dense<0.000000e+00> : vector<8x32xf32>
    %92 = tpu.matmul %91, %3, %cst_35 {dimension_numbers = #tpu.dot_dimension_numbers<[1], [0], [0], [1], [0, 0, 1, 1], [], []>} : vector<8x32xbf16>, vector<32x32xbf16>, vector<8x32xf32> -> vector<8x32xf32>
    %93 = vector.broadcast %4 : vector<1x32xf32> to vector<8x32xf32>
    %94 = arith.addf %92, %93 : vector<8x32xf32>
    %95 = vector.shape_cast %49 : vector<8x1xi1> to vector<8x1xi1>
    %96 = vector.broadcast %95 : vector<8x1xi1> to vector<8x32xi1>
    %97 = arith.select %96, %94, %16 : vector<8x32xi1>, vector<8x32xf32>
    %98 = vector.shape_cast %49 : vector<8x1xi1> to vector<8x1xi1>
    %99 = vector.broadcast %98 : vector<8x1xi1> to vector<8x32xi1>
    %100 = arith.select %99, %90, %19 : vector<8x32xi1>, vector<8x32xf32>
    %101 = vector.shape_cast %49 : vector<8x1xi1> to vector<8x1xi1>
    %102 = vector.broadcast %101 : vector<8x1xi1> to vector<8x32xi1>
    %103 = arith.select %102, %88, %22 : vector<8x32xi1>, vector<8x32xf32>
    %c0_36 = arith.constant 0 : index
    %c32 = arith.constant 32 : index
    %104 = vector.load %arg0[%c0_36, %c32] : memref<8x256xf32, #tpu.memory_space<vmem>>, vector<8x32xf32>
    %105 = arith.addf %104, %97 : vector<8x32xf32>
    %cst_37 = arith.constant 0.000000e+00 : f32
    %106 = vector.broadcast %cst_37 : f32 to vector<8x32xf32>
    %107 = arith.maximumf %105, %106 : vector<8x32xf32>
    %cst_38 = arith.constant dense<0.000000e+00> : vector<8x128xf32>
    %108 = tpu.matmul %107, %5, %cst_38 {dimension_numbers = #tpu.dot_dimension_numbers<[1], [0], [0], [1], [0, 0, 1, 1], [], []>} : vector<8x32xf32>, vector<32x128xf32>, vector<8x128xf32> -> vector<8x128xf32>
    %109 = vector.broadcast %6 : vector<1x128xf32> to vector<8x128xf32>
    %110 = arith.addf %108, %109 : vector<8x128xf32>
    %cst_39 = arith.constant dense<0xFF800000> : vector<8xf32>
    %111 = vector.multi_reduction <maximumf>, %110, %cst_39 [1] : vector<8x128xf32> to vector<8xf32>
    %112 = vector.shape_cast %111 : vector<8xf32> to vector<8x1xf32>
    %113 = vector.broadcast %112 : vector<8x1xf32> to vector<8x128xf32>
    %114 = arith.subf %110, %113 : vector<8x128xf32>
    %115 = math.exp %114 : vector<8x128xf32>
    %cst_40 = arith.constant dense<0.000000e+00> : vector<8xf32>
    %116 = vector.multi_reduction <add>, %115, %cst_40 [1] : vector<8x128xf32> to vector<8xf32>
    %117 = vector.shape_cast %116 : vector<8xf32> to vector<8x1xf32>
    %118 = vector.broadcast %112 : vector<8x1xf32> to vector<8x128xf32>
    %119 = arith.cmpf oge, %110, %118 : vector<8x128xf32>
    %c128_i32_41 = arith.constant 128 : i32
    %120 = vector.broadcast %c128_i32_41 : i32 to vector<8x128xi32>
    %121 = arith.select %119, %7, %120 : vector<8x128xi1>, vector<8x128xi32>
    %cst_42 = arith.constant dense<2147483647> : vector<8xi32>
    %122 = vector.multi_reduction <minsi>, %121, %cst_42 [1] : vector<8x128xi32> to vector<8xi32>
    %123 = vector.shape_cast %122 : vector<8xi32> to vector<8x1xi32>
    %124 = math.log %117 : vector<8x1xf32>
    %cst_43 = arith.constant 0.000000e+00 : f32
    %125 = vector.broadcast %cst_43 : f32 to vector<8x1xf32>
    %126 = arith.subf %125, %124 : vector<8x1xf32>
    %c127_i32_44 = arith.constant 127 : i32
    %127 = vector.broadcast %c127_i32_44 : i32 to vector<8x1xi32>
    %128 = arith.cmpi ne, %123, %127 : vector<8x1xi32>
    %cst_45 = arith.constant 0.000000e+00 : f32
    %129 = vector.broadcast %cst_45 : f32 to vector<8x1xf32>
    %130 = arith.select %128, %126, %129 : vector<8x1xi1>, vector<8x1xf32>
    %131 = arith.addf %52, %130 : vector<8x1xf32>
    %c-1_i32_46 = arith.constant -1 : i32
    %132 = vector.broadcast %c-1_i32_46 : i32 to vector<8x1xi32>
    %133 = arith.select %128, %123, %132 : vector<8x1xi1>, vector<8x1xi32>
    %c1_i32 = arith.constant 1 : i32
    %134 = vector.broadcast %c1_i32 : i32 to vector<8x128xi32>
    %135 = arith.cmpi eq, %8, %134 : vector<8x128xi32>
    %136 = vector.shape_cast %133 : vector<8x1xi32> to vector<8x1xi32>
    %137 = vector.broadcast %136 : vector<8x1xi32> to vector<8x128xi32>
    %138 = arith.select %135, %137, %59 : vector<8x128xi1>, vector<8x128xi32>
    %139 = vector.broadcast %123 : vector<8x1xi32> to vector<8x128xi32>
    %140 = arith.cmpi eq, %7, %139 : vector<8x128xi32>
    %141 = arith.extui %140 : vector<8x128xi1> to vector<8x128xi32>
    %142 = arith.sitofp %141 : vector<8x128xi32> to vector<8x128xf32>
    %143 = arith.truncf %142 : vector<8x128xf32> to vector<8x128xbf16>
    %144 = vector.shape_cast %128 : vector<8x1xi1> to vector<8x1xi1>
    %145 = vector.broadcast %144 : vector<8x1xi1> to vector<8x128xi1>
    %146 = arith.select %145, %143, %67 : vector<8x128xi1>, vector<8x128xbf16>
    %cst_47 = arith.constant dense<0.000000e+00> : vector<8x128xf32>
    %147 = tpu.matmul %146, %0, %cst_47 {dimension_numbers = #tpu.dot_dimension_numbers<[1], [0], [0], [1], [0, 0, 1, 1], [], []>} : vector<8x128xbf16>, vector<128x128xbf16>, vector<8x128xf32> -> vector<8x128xf32>
    %148 = arith.truncf %100 : vector<8x32xf32> to vector<8x32xbf16>
    %cst_48 = arith.constant dense<0.000000e+00> : vector<8x128xf32>
    %149 = tpu.matmul %148, %1, %cst_48 {dimension_numbers = #tpu.dot_dimension_numbers<[1], [0], [0], [1], [0, 0, 1, 1], [], []>} : vector<8x32xbf16>, vector<32x128xbf16>, vector<8x128xf32> -> vector<8x128xf32>
    %150 = arith.addf %147, %149 : vector<8x128xf32>
    %151 = vector.broadcast %2 : vector<1x128xf32> to vector<8x128xf32>
    %152 = arith.addf %150, %151 : vector<8x128xf32>
    %cst_49 = arith.constant 5.000000e-01 : f32
    %153 = vector.broadcast %cst_49 : f32 to vector<8x128xf32>
    %154 = arith.mulf %153, %152 : vector<8x128xf32>
    %155 = math.tanh %154 : vector<8x128xf32>
    %cst_50 = arith.constant 1.000000e+00 : f32
    %156 = vector.broadcast %cst_50 : f32 to vector<8x128xf32>
    %157 = arith.addf %155, %156 : vector<8x128xf32>
    %cst_51 = arith.constant 5.000000e-01 : f32
    %158 = vector.broadcast %cst_51 : f32 to vector<8x128xf32>
    %159 = arith.mulf %158, %157 : vector<8x128xf32>
    %160 = math.tanh %152 : vector<8x128xf32>
    %161 = vector.extract_strided_slice %159 {offsets = [0, 0], sizes = [8, 32], strides = [1, 1]} : vector<8x128xf32> to vector<8x32xf32>
    %162 = vector.extract_strided_slice %159 {offsets = [0, 32], sizes = [8, 32], strides = [1, 1]} : vector<8x128xf32> to vector<8x32xf32>
    %163 = vector.extract_strided_slice %160 {offsets = [0, 64], sizes = [8, 32], strides = [1, 1]} : vector<8x128xf32> to vector<8x32xf32>
    %164 = vector.extract_strided_slice %159 {offsets = [0, 96], sizes = [8, 32], strides = [1, 1]} : vector<8x128xf32> to vector<8x32xf32>
    %165 = arith.mulf %162, %103 : vector<8x32xf32>
    %166 = arith.mulf %161, %163 : vector<8x32xf32>
    %167 = arith.addf %165, %166 : vector<8x32xf32>
    %168 = math.tanh %167 : vector<8x32xf32>
    %169 = arith.mulf %164, %168 : vector<8x32xf32>
    %170 = arith.truncf %169 : vector<8x32xf32> to vector<8x32xbf16>
    %cst_52 = arith.constant dense<0.000000e+00> : vector<8x32xf32>
    %171 = tpu.matmul %170, %3, %cst_52 {dimension_numbers = #tpu.dot_dimension_numbers<[1], [0], [0], [1], [0, 0, 1, 1], [], []>} : vector<8x32xbf16>, vector<32x32xbf16>, vector<8x32xf32> -> vector<8x32xf32>
    %172 = vector.broadcast %4 : vector<1x32xf32> to vector<8x32xf32>
    %173 = arith.addf %171, %172 : vector<8x32xf32>
    %174 = vector.shape_cast %128 : vector<8x1xi1> to vector<8x1xi1>
    %175 = vector.broadcast %174 : vector<8x1xi1> to vector<8x32xi1>
    %176 = arith.select %175, %173, %97 : vector<8x32xi1>, vector<8x32xf32>
    %177 = vector.shape_cast %128 : vector<8x1xi1> to vector<8x1xi1>
    %178 = vector.broadcast %177 : vector<8x1xi1> to vector<8x32xi1>
    %179 = arith.select %178, %169, %100 : vector<8x32xi1>, vector<8x32xf32>
    %180 = vector.shape_cast %128 : vector<8x1xi1> to vector<8x1xi1>
    %181 = vector.broadcast %180 : vector<8x1xi1> to vector<8x32xi1>
    %182 = arith.select %181, %167, %103 : vector<8x32xi1>, vector<8x32xf32>
    %c0_53 = arith.constant 0 : index
    %c64 = arith.constant 64 : index
    %183 = vector.load %arg0[%c0_53, %c64] : memref<8x256xf32, #tpu.memory_space<vmem>>, vector<8x32xf32>
    %184 = arith.addf %183, %176 : vector<8x32xf32>
    %cst_54 = arith.constant 0.000000e+00 : f32
    %185 = vector.broadcast %cst_54 : f32 to vector<8x32xf32>
    %186 = arith.maximumf %184, %185 : vector<8x32xf32>
    %cst_55 = arith.constant dense<0.000000e+00> : vector<8x128xf32>
    %187 = tpu.matmul %186, %5, %cst_55 {dimension_numbers = #tpu.dot_dimension_numbers<[1], [0], [0], [1], [0, 0, 1, 1], [], []>} : vector<8x32xf32>, vector<32x128xf32>, vector<8x128xf32> -> vector<8x128xf32>
    %188 = vector.broadcast %6 : vector<1x128xf32> to vector<8x128xf32>
    %189 = arith.addf %187, %188 : vector<8x128xf32>
    %cst_56 = arith.constant dense<0xFF800000> : vector<8xf32>
    %190 = vector.multi_reduction <maximumf>, %189, %cst_56 [1] : vector<8x128xf32> to vector<8xf32>
    %191 = vector.shape_cast %190 : vector<8xf32> to vector<8x1xf32>
    %192 = vector.broadcast %191 : vector<8x1xf32> to vector<8x128xf32>
    %193 = arith.subf %189, %192 : vector<8x128xf32>
    %194 = math.exp %193 : vector<8x128xf32>
    %cst_57 = arith.constant dense<0.000000e+00> : vector<8xf32>
    %195 = vector.multi_reduction <add>, %194, %cst_57 [1] : vector<8x128xf32> to vector<8xf32>
    %196 = vector.shape_cast %195 : vector<8xf32> to vector<8x1xf32>
    %197 = vector.broadcast %191 : vector<8x1xf32> to vector<8x128xf32>
    %198 = arith.cmpf oge, %189, %197 : vector<8x128xf32>
    %c128_i32_58 = arith.constant 128 : i32
    %199 = vector.broadcast %c128_i32_58 : i32 to vector<8x128xi32>
    %200 = arith.select %198, %7, %199 : vector<8x128xi1>, vector<8x128xi32>
    %cst_59 = arith.constant dense<2147483647> : vector<8xi32>
    %201 = vector.multi_reduction <minsi>, %200, %cst_59 [1] : vector<8x128xi32> to vector<8xi32>
    %202 = vector.shape_cast %201 : vector<8xi32> to vector<8x1xi32>
    %203 = math.log %196 : vector<8x1xf32>
    %cst_60 = arith.constant 0.000000e+00 : f32
    %204 = vector.broadcast %cst_60 : f32 to vector<8x1xf32>
    %205 = arith.subf %204, %203 : vector<8x1xf32>
    %c127_i32_61 = arith.constant 127 : i32
    %206 = vector.broadcast %c127_i32_61 : i32 to vector<8x1xi32>
    %207 = arith.cmpi ne, %202, %206 : vector<8x1xi32>
    %cst_62 = arith.constant 0.000000e+00 : f32
    %208 = vector.broadcast %cst_62 : f32 to vector<8x1xf32>
    %209 = arith.select %207, %205, %208 : vector<8x1xi1>, vector<8x1xf32>
    %210 = arith.addf %131, %209 : vector<8x1xf32>
    %c-1_i32_63 = arith.constant -1 : i32
    %211 = vector.broadcast %c-1_i32_63 : i32 to vector<8x1xi32>
    %212 = arith.select %207, %202, %211 : vector<8x1xi1>, vector<8x1xi32>
    %c2_i32 = arith.constant 2 : i32
    %213 = vector.broadcast %c2_i32 : i32 to vector<8x128xi32>
    %214 = arith.cmpi eq, %8, %213 : vector<8x128xi32>
    %215 = vector.shape_cast %212 : vector<8x1xi32> to vector<8x1xi32>
    %216 = vector.broadcast %215 : vector<8x1xi32> to vector<8x128xi32>
    %217 = arith.select %214, %216, %138 : vector<8x128xi1>, vector<8x128xi32>
    %218 = vector.broadcast %202 : vector<8x1xi32> to vector<8x128xi32>
    %219 = arith.cmpi eq, %7, %218 : vector<8x128xi32>
    %220 = arith.extui %219 : vector<8x128xi1> to vector<8x128xi32>
    %221 = arith.sitofp %220 : vector<8x128xi32> to vector<8x128xf32>
    %222 = arith.truncf %221 : vector<8x128xf32> to vector<8x128xbf16>
    %223 = vector.shape_cast %207 : vector<8x1xi1> to vector<8x1xi1>
    %224 = vector.broadcast %223 : vector<8x1xi1> to vector<8x128xi1>
    %225 = arith.select %224, %222, %146 : vector<8x128xi1>, vector<8x128xbf16>
    %cst_64 = arith.constant dense<0.000000e+00> : vector<8x128xf32>
    %226 = tpu.matmul %225, %0, %cst_64 {dimension_numbers = #tpu.dot_dimension_numbers<[1], [0], [0], [1], [0, 0, 1, 1], [], []>} : vector<8x128xbf16>, vector<128x128xbf16>, vector<8x128xf32> -> vector<8x128xf32>
    %227 = arith.truncf %179 : vector<8x32xf32> to vector<8x32xbf16>
    %cst_65 = arith.constant dense<0.000000e+00> : vector<8x128xf32>
    %228 = tpu.matmul %227, %1, %cst_65 {dimension_numbers = #tpu.dot_dimension_numbers<[1], [0], [0], [1], [0, 0, 1, 1], [], []>} : vector<8x32xbf16>, vector<32x128xbf16>, vector<8x128xf32> -> vector<8x128xf32>
    %229 = arith.addf %226, %228 : vector<8x128xf32>
    %230 = vector.broadcast %2 : vector<1x128xf32> to vector<8x128xf32>
    %231 = arith.addf %229, %230 : vector<8x128xf32>
    %cst_66 = arith.constant 5.000000e-01 : f32
    %232 = vector.broadcast %cst_66 : f32 to vector<8x128xf32>
    %233 = arith.mulf %232, %231 : vector<8x128xf32>
    %234 = math.tanh %233 : vector<8x128xf32>
    %cst_67 = arith.constant 1.000000e+00 : f32
    %235 = vector.broadcast %cst_67 : f32 to vector<8x128xf32>
    %236 = arith.addf %234, %235 : vector<8x128xf32>
    %cst_68 = arith.constant 5.000000e-01 : f32
    %237 = vector.broadcast %cst_68 : f32 to vector<8x128xf32>
    %238 = arith.mulf %237, %236 : vector<8x128xf32>
    %239 = math.tanh %231 : vector<8x128xf32>
    %240 = vector.extract_strided_slice %238 {offsets = [0, 0], sizes = [8, 32], strides = [1, 1]} : vector<8x128xf32> to vector<8x32xf32>
    %241 = vector.extract_strided_slice %238 {offsets = [0, 32], sizes = [8, 32], strides = [1, 1]} : vector<8x128xf32> to vector<8x32xf32>
    %242 = vector.extract_strided_slice %239 {offsets = [0, 64], sizes = [8, 32], strides = [1, 1]} : vector<8x128xf32> to vector<8x32xf32>
    %243 = vector.extract_strided_slice %238 {offsets = [0, 96], sizes = [8, 32], strides = [1, 1]} : vector<8x128xf32> to vector<8x32xf32>
    %244 = arith.mulf %241, %182 : vector<8x32xf32>
    %245 = arith.mulf %240, %242 : vector<8x32xf32>
    %246 = arith.addf %244, %245 : vector<8x32xf32>
    %247 = math.tanh %246 : vector<8x32xf32>
    %248 = arith.mulf %243, %247 : vector<8x32xf32>
    %249 = arith.truncf %248 : vector<8x32xf32> to vector<8x32xbf16>
    %cst_69 = arith.constant dense<0.000000e+00> : vector<8x32xf32>
    %250 = tpu.matmul %249, %3, %cst_69 {dimension_numbers = #tpu.dot_dimension_numbers<[1], [0], [0], [1], [0, 0, 1, 1], [], []>} : vector<8x32xbf16>, vector<32x32xbf16>, vector<8x32xf32> -> vector<8x32xf32>
    %251 = vector.broadcast %4 : vector<1x32xf32> to vector<8x32xf32>
    %252 = arith.addf %250, %251 : vector<8x32xf32>
    %253 = vector.shape_cast %207 : vector<8x1xi1> to vector<8x1xi1>
    %254 = vector.broadcast %253 : vector<8x1xi1> to vector<8x32xi1>
    %255 = arith.select %254, %252, %176 : vector<8x32xi1>, vector<8x32xf32>
    %256 = vector.shape_cast %207 : vector<8x1xi1> to vector<8x1xi1>
    %257 = vector.broadcast %256 : vector<8x1xi1> to vector<8x32xi1>
    %258 = arith.select %257, %248, %179 : vector<8x32xi1>, vector<8x32xf32>
    %259 = vector.shape_cast %207 : vector<8x1xi1> to vector<8x1xi1>
    %260 = vector.broadcast %259 : vector<8x1xi1> to vector<8x32xi1>
    %261 = arith.select %260, %246, %182 : vector<8x32xi1>, vector<8x32xf32>
    %c0_70 = arith.constant 0 : index
    %c96 = arith.constant 96 : index
    %262 = vector.load %arg0[%c0_70, %c96] : memref<8x256xf32, #tpu.memory_space<vmem>>, vector<8x32xf32>
    %263 = arith.addf %262, %255 : vector<8x32xf32>
    %cst_71 = arith.constant 0.000000e+00 : f32
    %264 = vector.broadcast %cst_71 : f32 to vector<8x32xf32>
    %265 = arith.maximumf %263, %264 : vector<8x32xf32>
    %cst_72 = arith.constant dense<0.000000e+00> : vector<8x128xf32>
    %266 = tpu.matmul %265, %5, %cst_72 {dimension_numbers = #tpu.dot_dimension_numbers<[1], [0], [0], [1], [0, 0, 1, 1], [], []>} : vector<8x32xf32>, vector<32x128xf32>, vector<8x128xf32> -> vector<8x128xf32>
    %267 = vector.broadcast %6 : vector<1x128xf32> to vector<8x128xf32>
    %268 = arith.addf %266, %267 : vector<8x128xf32>
    %cst_73 = arith.constant dense<0xFF800000> : vector<8xf32>
    %269 = vector.multi_reduction <maximumf>, %268, %cst_73 [1] : vector<8x128xf32> to vector<8xf32>
    %270 = vector.shape_cast %269 : vector<8xf32> to vector<8x1xf32>
    %271 = vector.broadcast %270 : vector<8x1xf32> to vector<8x128xf32>
    %272 = arith.subf %268, %271 : vector<8x128xf32>
    %273 = math.exp %272 : vector<8x128xf32>
    %cst_74 = arith.constant dense<0.000000e+00> : vector<8xf32>
    %274 = vector.multi_reduction <add>, %273, %cst_74 [1] : vector<8x128xf32> to vector<8xf32>
    %275 = vector.shape_cast %274 : vector<8xf32> to vector<8x1xf32>
    %276 = vector.broadcast %270 : vector<8x1xf32> to vector<8x128xf32>
    %277 = arith.cmpf oge, %268, %276 : vector<8x128xf32>
    %c128_i32_75 = arith.constant 128 : i32
    %278 = vector.broadcast %c128_i32_75 : i32 to vector<8x128xi32>
    %279 = arith.select %277, %7, %278 : vector<8x128xi1>, vector<8x128xi32>
    %cst_76 = arith.constant dense<2147483647> : vector<8xi32>
    %280 = vector.multi_reduction <minsi>, %279, %cst_76 [1] : vector<8x128xi32> to vector<8xi32>
    %281 = vector.shape_cast %280 : vector<8xi32> to vector<8x1xi32>
    %282 = math.log %275 : vector<8x1xf32>
    %cst_77 = arith.constant 0.000000e+00 : f32
    %283 = vector.broadcast %cst_77 : f32 to vector<8x1xf32>
    %284 = arith.subf %283, %282 : vector<8x1xf32>
    %c127_i32_78 = arith.constant 127 : i32
    %285 = vector.broadcast %c127_i32_78 : i32 to vector<8x1xi32>
    %286 = arith.cmpi ne, %281, %285 : vector<8x1xi32>
    %cst_79 = arith.constant 0.000000e+00 : f32
    %287 = vector.broadcast %cst_79 : f32 to vector<8x1xf32>
    %288 = arith.select %286, %284, %287 : vector<8x1xi1>, vector<8x1xf32>
    %289 = arith.addf %210, %288 : vector<8x1xf32>
    %c-1_i32_80 = arith.constant -1 : i32
    %290 = vector.broadcast %c-1_i32_80 : i32 to vector<8x1xi32>
    %291 = arith.select %286, %281, %290 : vector<8x1xi1>, vector<8x1xi32>
    %c3_i32 = arith.constant 3 : i32
    %292 = vector.broadcast %c3_i32 : i32 to vector<8x128xi32>
    %293 = arith.cmpi eq, %8, %292 : vector<8x128xi32>
    %294 = vector.shape_cast %291 : vector<8x1xi32> to vector<8x1xi32>
    %295 = vector.broadcast %294 : vector<8x1xi32> to vector<8x128xi32>
    %296 = arith.select %293, %295, %217 : vector<8x128xi1>, vector<8x128xi32>
    %297 = vector.broadcast %281 : vector<8x1xi32> to vector<8x128xi32>
    %298 = arith.cmpi eq, %7, %297 : vector<8x128xi32>
    %299 = arith.extui %298 : vector<8x128xi1> to vector<8x128xi32>
    %300 = arith.sitofp %299 : vector<8x128xi32> to vector<8x128xf32>
    %301 = arith.truncf %300 : vector<8x128xf32> to vector<8x128xbf16>
    %302 = vector.shape_cast %286 : vector<8x1xi1> to vector<8x1xi1>
    %303 = vector.broadcast %302 : vector<8x1xi1> to vector<8x128xi1>
    %304 = arith.select %303, %301, %225 : vector<8x128xi1>, vector<8x128xbf16>
    %cst_81 = arith.constant dense<0.000000e+00> : vector<8x128xf32>
    %305 = tpu.matmul %304, %0, %cst_81 {dimension_numbers = #tpu.dot_dimension_numbers<[1], [0], [0], [1], [0, 0, 1, 1], [], []>} : vector<8x128xbf16>, vector<128x128xbf16>, vector<8x128xf32> -> vector<8x128xf32>
    %306 = arith.truncf %258 : vector<8x32xf32> to vector<8x32xbf16>
    %cst_82 = arith.constant dense<0.000000e+00> : vector<8x128xf32>
    %307 = tpu.matmul %306, %1, %cst_82 {dimension_numbers = #tpu.dot_dimension_numbers<[1], [0], [0], [1], [0, 0, 1, 1], [], []>} : vector<8x32xbf16>, vector<32x128xbf16>, vector<8x128xf32> -> vector<8x128xf32>
    %308 = arith.addf %305, %307 : vector<8x128xf32>
    %309 = vector.broadcast %2 : vector<1x128xf32> to vector<8x128xf32>
    %310 = arith.addf %308, %309 : vector<8x128xf32>
    %cst_83 = arith.constant 5.000000e-01 : f32
    %311 = vector.broadcast %cst_83 : f32 to vector<8x128xf32>
    %312 = arith.mulf %311, %310 : vector<8x128xf32>
    %313 = math.tanh %312 : vector<8x128xf32>
    %cst_84 = arith.constant 1.000000e+00 : f32
    %314 = vector.broadcast %cst_84 : f32 to vector<8x128xf32>
    %315 = arith.addf %313, %314 : vector<8x128xf32>
    %cst_85 = arith.constant 5.000000e-01 : f32
    %316 = vector.broadcast %cst_85 : f32 to vector<8x128xf32>
    %317 = arith.mulf %316, %315 : vector<8x128xf32>
    %318 = math.tanh %310 : vector<8x128xf32>
    %319 = vector.extract_strided_slice %317 {offsets = [0, 0], sizes = [8, 32], strides = [1, 1]} : vector<8x128xf32> to vector<8x32xf32>
    %320 = vector.extract_strided_slice %317 {offsets = [0, 32], sizes = [8, 32], strides = [1, 1]} : vector<8x128xf32> to vector<8x32xf32>
    %321 = vector.extract_strided_slice %318 {offsets = [0, 64], sizes = [8, 32], strides = [1, 1]} : vector<8x128xf32> to vector<8x32xf32>
    %322 = vector.extract_strided_slice %317 {offsets = [0, 96], sizes = [8, 32], strides = [1, 1]} : vector<8x128xf32> to vector<8x32xf32>
    %323 = arith.mulf %320, %261 : vector<8x32xf32>
    %324 = arith.mulf %319, %321 : vector<8x32xf32>
    %325 = arith.addf %323, %324 : vector<8x32xf32>
    %326 = math.tanh %325 : vector<8x32xf32>
    %327 = arith.mulf %322, %326 : vector<8x32xf32>
    %328 = arith.truncf %327 : vector<8x32xf32> to vector<8x32xbf16>
    %cst_86 = arith.constant dense<0.000000e+00> : vector<8x32xf32>
    %329 = tpu.matmul %328, %3, %cst_86 {dimension_numbers = #tpu.dot_dimension_numbers<[1], [0], [0], [1], [0, 0, 1, 1], [], []>} : vector<8x32xbf16>, vector<32x32xbf16>, vector<8x32xf32> -> vector<8x32xf32>
    %330 = vector.broadcast %4 : vector<1x32xf32> to vector<8x32xf32>
    %331 = arith.addf %329, %330 : vector<8x32xf32>
    %332 = vector.shape_cast %286 : vector<8x1xi1> to vector<8x1xi1>
    %333 = vector.broadcast %332 : vector<8x1xi1> to vector<8x32xi1>
    %334 = arith.select %333, %331, %255 : vector<8x32xi1>, vector<8x32xf32>
    %335 = vector.shape_cast %286 : vector<8x1xi1> to vector<8x1xi1>
    %336 = vector.broadcast %335 : vector<8x1xi1> to vector<8x32xi1>
    %337 = arith.select %336, %327, %258 : vector<8x32xi1>, vector<8x32xf32>
    %338 = vector.shape_cast %286 : vector<8x1xi1> to vector<8x1xi1>
    %339 = vector.broadcast %338 : vector<8x1xi1> to vector<8x32xi1>
    %340 = arith.select %339, %325, %261 : vector<8x32xi1>, vector<8x32xf32>
    %c0_87 = arith.constant 0 : index
    %c128 = arith.constant 128 : index
    %341 = vector.load %arg0[%c0_87, %c128] : memref<8x256xf32, #tpu.memory_space<vmem>>, vector<8x32xf32>
    %342 = arith.addf %341, %334 : vector<8x32xf32>
    %cst_88 = arith.constant 0.000000e+00 : f32
    %343 = vector.broadcast %cst_88 : f32 to vector<8x32xf32>
    %344 = arith.maximumf %342, %343 : vector<8x32xf32>
    %cst_89 = arith.constant dense<0.000000e+00> : vector<8x128xf32>
    %345 = tpu.matmul %344, %5, %cst_89 {dimension_numbers = #tpu.dot_dimension_numbers<[1], [0], [0], [1], [0, 0, 1, 1], [], []>} : vector<8x32xf32>, vector<32x128xf32>, vector<8x128xf32> -> vector<8x128xf32>
    %346 = vector.broadcast %6 : vector<1x128xf32> to vector<8x128xf32>
    %347 = arith.addf %345, %346 : vector<8x128xf32>
    %cst_90 = arith.constant dense<0xFF800000> : vector<8xf32>
    %348 = vector.multi_reduction <maximumf>, %347, %cst_90 [1] : vector<8x128xf32> to vector<8xf32>
    %349 = vector.shape_cast %348 : vector<8xf32> to vector<8x1xf32>
    %350 = vector.broadcast %349 : vector<8x1xf32> to vector<8x128xf32>
    %351 = arith.subf %347, %350 : vector<8x128xf32>
    %352 = math.exp %351 : vector<8x128xf32>
    %cst_91 = arith.constant dense<0.000000e+00> : vector<8xf32>
    %353 = vector.multi_reduction <add>, %352, %cst_91 [1] : vector<8x128xf32> to vector<8xf32>
    %354 = vector.shape_cast %353 : vector<8xf32> to vector<8x1xf32>
    %355 = vector.broadcast %349 : vector<8x1xf32> to vector<8x128xf32>
    %356 = arith.cmpf oge, %347, %355 : vector<8x128xf32>
    %c128_i32_92 = arith.constant 128 : i32
    %357 = vector.broadcast %c128_i32_92 : i32 to vector<8x128xi32>
    %358 = arith.select %356, %7, %357 : vector<8x128xi1>, vector<8x128xi32>
    %cst_93 = arith.constant dense<2147483647> : vector<8xi32>
    %359 = vector.multi_reduction <minsi>, %358, %cst_93 [1] : vector<8x128xi32> to vector<8xi32>
    %360 = vector.shape_cast %359 : vector<8xi32> to vector<8x1xi32>
    %361 = math.log %354 : vector<8x1xf32>
    %cst_94 = arith.constant 0.000000e+00 : f32
    %362 = vector.broadcast %cst_94 : f32 to vector<8x1xf32>
    %363 = arith.subf %362, %361 : vector<8x1xf32>
    %c127_i32_95 = arith.constant 127 : i32
    %364 = vector.broadcast %c127_i32_95 : i32 to vector<8x1xi32>
    %365 = arith.cmpi ne, %360, %364 : vector<8x1xi32>
    %cst_96 = arith.constant 0.000000e+00 : f32
    %366 = vector.broadcast %cst_96 : f32 to vector<8x1xf32>
    %367 = arith.select %365, %363, %366 : vector<8x1xi1>, vector<8x1xf32>
    %368 = arith.addf %289, %367 : vector<8x1xf32>
    %c-1_i32_97 = arith.constant -1 : i32
    %369 = vector.broadcast %c-1_i32_97 : i32 to vector<8x1xi32>
    %370 = arith.select %365, %360, %369 : vector<8x1xi1>, vector<8x1xi32>
    %c4_i32 = arith.constant 4 : i32
    %371 = vector.broadcast %c4_i32 : i32 to vector<8x128xi32>
    %372 = arith.cmpi eq, %8, %371 : vector<8x128xi32>
    %373 = vector.shape_cast %370 : vector<8x1xi32> to vector<8x1xi32>
    %374 = vector.broadcast %373 : vector<8x1xi32> to vector<8x128xi32>
    %375 = arith.select %372, %374, %296 : vector<8x128xi1>, vector<8x128xi32>
    %376 = vector.broadcast %360 : vector<8x1xi32> to vector<8x128xi32>
    %377 = arith.cmpi eq, %7, %376 : vector<8x128xi32>
    %378 = arith.extui %377 : vector<8x128xi1> to vector<8x128xi32>
    %379 = arith.sitofp %378 : vector<8x128xi32> to vector<8x128xf32>
    %380 = arith.truncf %379 : vector<8x128xf32> to vector<8x128xbf16>
    %381 = vector.shape_cast %365 : vector<8x1xi1> to vector<8x1xi1>
    %382 = vector.broadcast %381 : vector<8x1xi1> to vector<8x128xi1>
    %383 = arith.select %382, %380, %304 : vector<8x128xi1>, vector<8x128xbf16>
    %cst_98 = arith.constant dense<0.000000e+00> : vector<8x128xf32>
    %384 = tpu.matmul %383, %0, %cst_98 {dimension_numbers = #tpu.dot_dimension_numbers<[1], [0], [0], [1], [0, 0, 1, 1], [], []>} : vector<8x128xbf16>, vector<128x128xbf16>, vector<8x128xf32> -> vector<8x128xf32>
    %385 = arith.truncf %337 : vector<8x32xf32> to vector<8x32xbf16>
    %cst_99 = arith.constant dense<0.000000e+00> : vector<8x128xf32>
    %386 = tpu.matmul %385, %1, %cst_99 {dimension_numbers = #tpu.dot_dimension_numbers<[1], [0], [0], [1], [0, 0, 1, 1], [], []>} : vector<8x32xbf16>, vector<32x128xbf16>, vector<8x128xf32> -> vector<8x128xf32>
    %387 = arith.addf %384, %386 : vector<8x128xf32>
    %388 = vector.broadcast %2 : vector<1x128xf32> to vector<8x128xf32>
    %389 = arith.addf %387, %388 : vector<8x128xf32>
    %cst_100 = arith.constant 5.000000e-01 : f32
    %390 = vector.broadcast %cst_100 : f32 to vector<8x128xf32>
    %391 = arith.mulf %390, %389 : vector<8x128xf32>
    %392 = math.tanh %391 : vector<8x128xf32>
    %cst_101 = arith.constant 1.000000e+00 : f32
    %393 = vector.broadcast %cst_101 : f32 to vector<8x128xf32>
    %394 = arith.addf %392, %393 : vector<8x128xf32>
    %cst_102 = arith.constant 5.000000e-01 : f32
    %395 = vector.broadcast %cst_102 : f32 to vector<8x128xf32>
    %396 = arith.mulf %395, %394 : vector<8x128xf32>
    %397 = math.tanh %389 : vector<8x128xf32>
    %398 = vector.extract_strided_slice %396 {offsets = [0, 0], sizes = [8, 32], strides = [1, 1]} : vector<8x128xf32> to vector<8x32xf32>
    %399 = vector.extract_strided_slice %396 {offsets = [0, 32], sizes = [8, 32], strides = [1, 1]} : vector<8x128xf32> to vector<8x32xf32>
    %400 = vector.extract_strided_slice %397 {offsets = [0, 64], sizes = [8, 32], strides = [1, 1]} : vector<8x128xf32> to vector<8x32xf32>
    %401 = vector.extract_strided_slice %396 {offsets = [0, 96], sizes = [8, 32], strides = [1, 1]} : vector<8x128xf32> to vector<8x32xf32>
    %402 = arith.mulf %399, %340 : vector<8x32xf32>
    %403 = arith.mulf %398, %400 : vector<8x32xf32>
    %404 = arith.addf %402, %403 : vector<8x32xf32>
    %405 = math.tanh %404 : vector<8x32xf32>
    %406 = arith.mulf %401, %405 : vector<8x32xf32>
    %407 = arith.truncf %406 : vector<8x32xf32> to vector<8x32xbf16>
    %cst_103 = arith.constant dense<0.000000e+00> : vector<8x32xf32>
    %408 = tpu.matmul %407, %3, %cst_103 {dimension_numbers = #tpu.dot_dimension_numbers<[1], [0], [0], [1], [0, 0, 1, 1], [], []>} : vector<8x32xbf16>, vector<32x32xbf16>, vector<8x32xf32> -> vector<8x32xf32>
    %409 = vector.broadcast %4 : vector<1x32xf32> to vector<8x32xf32>
    %410 = arith.addf %408, %409 : vector<8x32xf32>
    %411 = vector.shape_cast %365 : vector<8x1xi1> to vector<8x1xi1>
    %412 = vector.broadcast %411 : vector<8x1xi1> to vector<8x32xi1>
    %413 = arith.select %412, %410, %334 : vector<8x32xi1>, vector<8x32xf32>
    %414 = vector.shape_cast %365 : vector<8x1xi1> to vector<8x1xi1>
    %415 = vector.broadcast %414 : vector<8x1xi1> to vector<8x32xi1>
    %416 = arith.select %415, %406, %337 : vector<8x32xi1>, vector<8x32xf32>
    %417 = vector.shape_cast %365 : vector<8x1xi1> to vector<8x1xi1>
    %418 = vector.broadcast %417 : vector<8x1xi1> to vector<8x32xi1>
    %419 = arith.select %418, %404, %340 : vector<8x32xi1>, vector<8x32xf32>
    %c0_104 = arith.constant 0 : index
    %c160 = arith.constant 160 : index
    %420 = vector.load %arg0[%c0_104, %c160] : memref<8x256xf32, #tpu.memory_space<vmem>>, vector<8x32xf32>
    %421 = arith.addf %420, %413 : vector<8x32xf32>
    %cst_105 = arith.constant 0.000000e+00 : f32
    %422 = vector.broadcast %cst_105 : f32 to vector<8x32xf32>
    %423 = arith.maximumf %421, %422 : vector<8x32xf32>
    %cst_106 = arith.constant dense<0.000000e+00> : vector<8x128xf32>
    %424 = tpu.matmul %423, %5, %cst_106 {dimension_numbers = #tpu.dot_dimension_numbers<[1], [0], [0], [1], [0, 0, 1, 1], [], []>} : vector<8x32xf32>, vector<32x128xf32>, vector<8x128xf32> -> vector<8x128xf32>
    %425 = vector.broadcast %6 : vector<1x128xf32> to vector<8x128xf32>
    %426 = arith.addf %424, %425 : vector<8x128xf32>
    %cst_107 = arith.constant dense<0xFF800000> : vector<8xf32>
    %427 = vector.multi_reduction <maximumf>, %426, %cst_107 [1] : vector<8x128xf32> to vector<8xf32>
    %428 = vector.shape_cast %427 : vector<8xf32> to vector<8x1xf32>
    %429 = vector.broadcast %428 : vector<8x1xf32> to vector<8x128xf32>
    %430 = arith.subf %426, %429 : vector<8x128xf32>
    %431 = math.exp %430 : vector<8x128xf32>
    %cst_108 = arith.constant dense<0.000000e+00> : vector<8xf32>
    %432 = vector.multi_reduction <add>, %431, %cst_108 [1] : vector<8x128xf32> to vector<8xf32>
    %433 = vector.shape_cast %432 : vector<8xf32> to vector<8x1xf32>
    %434 = vector.broadcast %428 : vector<8x1xf32> to vector<8x128xf32>
    %435 = arith.cmpf oge, %426, %434 : vector<8x128xf32>
    %c128_i32_109 = arith.constant 128 : i32
    %436 = vector.broadcast %c128_i32_109 : i32 to vector<8x128xi32>
    %437 = arith.select %435, %7, %436 : vector<8x128xi1>, vector<8x128xi32>
    %cst_110 = arith.constant dense<2147483647> : vector<8xi32>
    %438 = vector.multi_reduction <minsi>, %437, %cst_110 [1] : vector<8x128xi32> to vector<8xi32>
    %439 = vector.shape_cast %438 : vector<8xi32> to vector<8x1xi32>
    %440 = math.log %433 : vector<8x1xf32>
    %cst_111 = arith.constant 0.000000e+00 : f32
    %441 = vector.broadcast %cst_111 : f32 to vector<8x1xf32>
    %442 = arith.subf %441, %440 : vector<8x1xf32>
    %c127_i32_112 = arith.constant 127 : i32
    %443 = vector.broadcast %c127_i32_112 : i32 to vector<8x1xi32>
    %444 = arith.cmpi ne, %439, %443 : vector<8x1xi32>
    %cst_113 = arith.constant 0.000000e+00 : f32
    %445 = vector.broadcast %cst_113 : f32 to vector<8x1xf32>
    %446 = arith.select %444, %442, %445 : vector<8x1xi1>, vector<8x1xf32>
    %447 = arith.addf %368, %446 : vector<8x1xf32>
    %c-1_i32_114 = arith.constant -1 : i32
    %448 = vector.broadcast %c-1_i32_114 : i32 to vector<8x1xi32>
    %449 = arith.select %444, %439, %448 : vector<8x1xi1>, vector<8x1xi32>
    %c5_i32 = arith.constant 5 : i32
    %450 = vector.broadcast %c5_i32 : i32 to vector<8x128xi32>
    %451 = arith.cmpi eq, %8, %450 : vector<8x128xi32>
    %452 = vector.shape_cast %449 : vector<8x1xi32> to vector<8x1xi32>
    %453 = vector.broadcast %452 : vector<8x1xi32> to vector<8x128xi32>
    %454 = arith.select %451, %453, %375 : vector<8x128xi1>, vector<8x128xi32>
    %455 = vector.broadcast %439 : vector<8x1xi32> to vector<8x128xi32>
    %456 = arith.cmpi eq, %7, %455 : vector<8x128xi32>
    %457 = arith.extui %456 : vector<8x128xi1> to vector<8x128xi32>
    %458 = arith.sitofp %457 : vector<8x128xi32> to vector<8x128xf32>
    %459 = arith.truncf %458 : vector<8x128xf32> to vector<8x128xbf16>
    %460 = vector.shape_cast %444 : vector<8x1xi1> to vector<8x1xi1>
    %461 = vector.broadcast %460 : vector<8x1xi1> to vector<8x128xi1>
    %462 = arith.select %461, %459, %383 : vector<8x128xi1>, vector<8x128xbf16>
    %cst_115 = arith.constant dense<0.000000e+00> : vector<8x128xf32>
    %463 = tpu.matmul %462, %0, %cst_115 {dimension_numbers = #tpu.dot_dimension_numbers<[1], [0], [0], [1], [0, 0, 1, 1], [], []>} : vector<8x128xbf16>, vector<128x128xbf16>, vector<8x128xf32> -> vector<8x128xf32>
    %464 = arith.truncf %416 : vector<8x32xf32> to vector<8x32xbf16>
    %cst_116 = arith.constant dense<0.000000e+00> : vector<8x128xf32>
    %465 = tpu.matmul %464, %1, %cst_116 {dimension_numbers = #tpu.dot_dimension_numbers<[1], [0], [0], [1], [0, 0, 1, 1], [], []>} : vector<8x32xbf16>, vector<32x128xbf16>, vector<8x128xf32> -> vector<8x128xf32>
    %466 = arith.addf %463, %465 : vector<8x128xf32>
    %467 = vector.broadcast %2 : vector<1x128xf32> to vector<8x128xf32>
    %468 = arith.addf %466, %467 : vector<8x128xf32>
    %cst_117 = arith.constant 5.000000e-01 : f32
    %469 = vector.broadcast %cst_117 : f32 to vector<8x128xf32>
    %470 = arith.mulf %469, %468 : vector<8x128xf32>
    %471 = math.tanh %470 : vector<8x128xf32>
    %cst_118 = arith.constant 1.000000e+00 : f32
    %472 = vector.broadcast %cst_118 : f32 to vector<8x128xf32>
    %473 = arith.addf %471, %472 : vector<8x128xf32>
    %cst_119 = arith.constant 5.000000e-01 : f32
    %474 = vector.broadcast %cst_119 : f32 to vector<8x128xf32>
    %475 = arith.mulf %474, %473 : vector<8x128xf32>
    %476 = math.tanh %468 : vector<8x128xf32>
    %477 = vector.extract_strided_slice %475 {offsets = [0, 0], sizes = [8, 32], strides = [1, 1]} : vector<8x128xf32> to vector<8x32xf32>
    %478 = vector.extract_strided_slice %475 {offsets = [0, 32], sizes = [8, 32], strides = [1, 1]} : vector<8x128xf32> to vector<8x32xf32>
    %479 = vector.extract_strided_slice %476 {offsets = [0, 64], sizes = [8, 32], strides = [1, 1]} : vector<8x128xf32> to vector<8x32xf32>
    %480 = vector.extract_strided_slice %475 {offsets = [0, 96], sizes = [8, 32], strides = [1, 1]} : vector<8x128xf32> to vector<8x32xf32>
    %481 = arith.mulf %478, %419 : vector<8x32xf32>
    %482 = arith.mulf %477, %479 : vector<8x32xf32>
    %483 = arith.addf %481, %482 : vector<8x32xf32>
    %484 = math.tanh %483 : vector<8x32xf32>
    %485 = arith.mulf %480, %484 : vector<8x32xf32>
    %486 = arith.truncf %485 : vector<8x32xf32> to vector<8x32xbf16>
    %cst_120 = arith.constant dense<0.000000e+00> : vector<8x32xf32>
    %487 = tpu.matmul %486, %3, %cst_120 {dimension_numbers = #tpu.dot_dimension_numbers<[1], [0], [0], [1], [0, 0, 1, 1], [], []>} : vector<8x32xbf16>, vector<32x32xbf16>, vector<8x32xf32> -> vector<8x32xf32>
    %488 = vector.broadcast %4 : vector<1x32xf32> to vector<8x32xf32>
    %489 = arith.addf %487, %488 : vector<8x32xf32>
    %490 = vector.shape_cast %444 : vector<8x1xi1> to vector<8x1xi1>
    %491 = vector.broadcast %490 : vector<8x1xi1> to vector<8x32xi1>
    %492 = arith.select %491, %489, %413 : vector<8x32xi1>, vector<8x32xf32>
    %493 = vector.shape_cast %444 : vector<8x1xi1> to vector<8x1xi1>
    %494 = vector.broadcast %493 : vector<8x1xi1> to vector<8x32xi1>
    %495 = arith.select %494, %485, %416 : vector<8x32xi1>, vector<8x32xf32>
    %496 = vector.shape_cast %444 : vector<8x1xi1> to vector<8x1xi1>
    %497 = vector.broadcast %496 : vector<8x1xi1> to vector<8x32xi1>
    %498 = arith.select %497, %483, %419 : vector<8x32xi1>, vector<8x32xf32>
    %c0_121 = arith.constant 0 : index
    %c192 = arith.constant 192 : index
    %499 = vector.load %arg0[%c0_121, %c192] : memref<8x256xf32, #tpu.memory_space<vmem>>, vector<8x32xf32>
    %500 = arith.addf %499, %492 : vector<8x32xf32>
    %cst_122 = arith.constant 0.000000e+00 : f32
    %501 = vector.broadcast %cst_122 : f32 to vector<8x32xf32>
    %502 = arith.maximumf %500, %501 : vector<8x32xf32>
    %cst_123 = arith.constant dense<0.000000e+00> : vector<8x128xf32>
    %503 = tpu.matmul %502, %5, %cst_123 {dimension_numbers = #tpu.dot_dimension_numbers<[1], [0], [0], [1], [0, 0, 1, 1], [], []>} : vector<8x32xf32>, vector<32x128xf32>, vector<8x128xf32> -> vector<8x128xf32>
    %504 = vector.broadcast %6 : vector<1x128xf32> to vector<8x128xf32>
    %505 = arith.addf %503, %504 : vector<8x128xf32>
    %cst_124 = arith.constant dense<0xFF800000> : vector<8xf32>
    %506 = vector.multi_reduction <maximumf>, %505, %cst_124 [1] : vector<8x128xf32> to vector<8xf32>
    %507 = vector.shape_cast %506 : vector<8xf32> to vector<8x1xf32>
    %508 = vector.broadcast %507 : vector<8x1xf32> to vector<8x128xf32>
    %509 = arith.subf %505, %508 : vector<8x128xf32>
    %510 = math.exp %509 : vector<8x128xf32>
    %cst_125 = arith.constant dense<0.000000e+00> : vector<8xf32>
    %511 = vector.multi_reduction <add>, %510, %cst_125 [1] : vector<8x128xf32> to vector<8xf32>
    %512 = vector.shape_cast %511 : vector<8xf32> to vector<8x1xf32>
    %513 = vector.broadcast %507 : vector<8x1xf32> to vector<8x128xf32>
    %514 = arith.cmpf oge, %505, %513 : vector<8x128xf32>
    %c128_i32_126 = arith.constant 128 : i32
    %515 = vector.broadcast %c128_i32_126 : i32 to vector<8x128xi32>
    %516 = arith.select %514, %7, %515 : vector<8x128xi1>, vector<8x128xi32>
    %cst_127 = arith.constant dense<2147483647> : vector<8xi32>
    %517 = vector.multi_reduction <minsi>, %516, %cst_127 [1] : vector<8x128xi32> to vector<8xi32>
    %518 = vector.shape_cast %517 : vector<8xi32> to vector<8x1xi32>
    %519 = math.log %512 : vector<8x1xf32>
    %cst_128 = arith.constant 0.000000e+00 : f32
    %520 = vector.broadcast %cst_128 : f32 to vector<8x1xf32>
    %521 = arith.subf %520, %519 : vector<8x1xf32>
    %c127_i32_129 = arith.constant 127 : i32
    %522 = vector.broadcast %c127_i32_129 : i32 to vector<8x1xi32>
    %523 = arith.cmpi ne, %518, %522 : vector<8x1xi32>
    %cst_130 = arith.constant 0.000000e+00 : f32
    %524 = vector.broadcast %cst_130 : f32 to vector<8x1xf32>
    %525 = arith.select %523, %521, %524 : vector<8x1xi1>, vector<8x1xf32>
    %526 = arith.addf %447, %525 : vector<8x1xf32>
    %c-1_i32_131 = arith.constant -1 : i32
    %527 = vector.broadcast %c-1_i32_131 : i32 to vector<8x1xi32>
    %528 = arith.select %523, %518, %527 : vector<8x1xi1>, vector<8x1xi32>
    %c6_i32 = arith.constant 6 : i32
    %529 = vector.broadcast %c6_i32 : i32 to vector<8x128xi32>
    %530 = arith.cmpi eq, %8, %529 : vector<8x128xi32>
    %531 = vector.shape_cast %528 : vector<8x1xi32> to vector<8x1xi32>
    %532 = vector.broadcast %531 : vector<8x1xi32> to vector<8x128xi32>
    %533 = arith.select %530, %532, %454 : vector<8x128xi1>, vector<8x128xi32>
    %534 = vector.broadcast %518 : vector<8x1xi32> to vector<8x128xi32>
    %535 = arith.cmpi eq, %7, %534 : vector<8x128xi32>
    %536 = arith.extui %535 : vector<8x128xi1> to vector<8x128xi32>
    %537 = arith.sitofp %536 : vector<8x128xi32> to vector<8x128xf32>
    %538 = arith.truncf %537 : vector<8x128xf32> to vector<8x128xbf16>
    %539 = vector.shape_cast %523 : vector<8x1xi1> to vector<8x1xi1>
    %540 = vector.broadcast %539 : vector<8x1xi1> to vector<8x128xi1>
    %541 = arith.select %540, %538, %462 : vector<8x128xi1>, vector<8x128xbf16>
    %cst_132 = arith.constant dense<0.000000e+00> : vector<8x128xf32>
    %542 = tpu.matmul %541, %0, %cst_132 {dimension_numbers = #tpu.dot_dimension_numbers<[1], [0], [0], [1], [0, 0, 1, 1], [], []>} : vector<8x128xbf16>, vector<128x128xbf16>, vector<8x128xf32> -> vector<8x128xf32>
    %543 = arith.truncf %495 : vector<8x32xf32> to vector<8x32xbf16>
    %cst_133 = arith.constant dense<0.000000e+00> : vector<8x128xf32>
    %544 = tpu.matmul %543, %1, %cst_133 {dimension_numbers = #tpu.dot_dimension_numbers<[1], [0], [0], [1], [0, 0, 1, 1], [], []>} : vector<8x32xbf16>, vector<32x128xbf16>, vector<8x128xf32> -> vector<8x128xf32>
    %545 = arith.addf %542, %544 : vector<8x128xf32>
    %546 = vector.broadcast %2 : vector<1x128xf32> to vector<8x128xf32>
    %547 = arith.addf %545, %546 : vector<8x128xf32>
    %cst_134 = arith.constant 5.000000e-01 : f32
    %548 = vector.broadcast %cst_134 : f32 to vector<8x128xf32>
    %549 = arith.mulf %548, %547 : vector<8x128xf32>
    %550 = math.tanh %549 : vector<8x128xf32>
    %cst_135 = arith.constant 1.000000e+00 : f32
    %551 = vector.broadcast %cst_135 : f32 to vector<8x128xf32>
    %552 = arith.addf %550, %551 : vector<8x128xf32>
    %cst_136 = arith.constant 5.000000e-01 : f32
    %553 = vector.broadcast %cst_136 : f32 to vector<8x128xf32>
    %554 = arith.mulf %553, %552 : vector<8x128xf32>
    %555 = math.tanh %547 : vector<8x128xf32>
    %556 = vector.extract_strided_slice %554 {offsets = [0, 0], sizes = [8, 32], strides = [1, 1]} : vector<8x128xf32> to vector<8x32xf32>
    %557 = vector.extract_strided_slice %554 {offsets = [0, 32], sizes = [8, 32], strides = [1, 1]} : vector<8x128xf32> to vector<8x32xf32>
    %558 = vector.extract_strided_slice %555 {offsets = [0, 64], sizes = [8, 32], strides = [1, 1]} : vector<8x128xf32> to vector<8x32xf32>
    %559 = vector.extract_strided_slice %554 {offsets = [0, 96], sizes = [8, 32], strides = [1, 1]} : vector<8x128xf32> to vector<8x32xf32>
    %560 = arith.mulf %557, %498 : vector<8x32xf32>
    %561 = arith.mulf %556, %558 : vector<8x32xf32>
    %562 = arith.addf %560, %561 : vector<8x32xf32>
    %563 = math.tanh %562 : vector<8x32xf32>
    %564 = arith.mulf %559, %563 : vector<8x32xf32>
    %565 = arith.truncf %564 : vector<8x32xf32> to vector<8x32xbf16>
    %cst_137 = arith.constant dense<0.000000e+00> : vector<8x32xf32>
    %566 = tpu.matmul %565, %3, %cst_137 {dimension_numbers = #tpu.dot_dimension_numbers<[1], [0], [0], [1], [0, 0, 1, 1], [], []>} : vector<8x32xbf16>, vector<32x32xbf16>, vector<8x32xf32> -> vector<8x32xf32>
    %567 = vector.broadcast %4 : vector<1x32xf32> to vector<8x32xf32>
    %568 = arith.addf %566, %567 : vector<8x32xf32>
    %569 = vector.shape_cast %523 : vector<8x1xi1> to vector<8x1xi1>
    %570 = vector.broadcast %569 : vector<8x1xi1> to vector<8x32xi1>
    %571 = arith.select %570, %568, %492 : vector<8x32xi1>, vector<8x32xf32>
    %c0_138 = arith.constant 0 : index
    %c224 = arith.constant 224 : index
    %572 = vector.load %arg0[%c0_138, %c224] : memref<8x256xf32, #tpu.memory_space<vmem>>, vector<8x32xf32>
    %573 = arith.addf %572, %571 : vector<8x32xf32>
    %cst_139 = arith.constant 0.000000e+00 : f32
    %574 = vector.broadcast %cst_139 : f32 to vector<8x32xf32>
    %575 = arith.maximumf %573, %574 : vector<8x32xf32>
    %cst_140 = arith.constant dense<0.000000e+00> : vector<8x128xf32>
    %576 = tpu.matmul %575, %5, %cst_140 {dimension_numbers = #tpu.dot_dimension_numbers<[1], [0], [0], [1], [0, 0, 1, 1], [], []>} : vector<8x32xf32>, vector<32x128xf32>, vector<8x128xf32> -> vector<8x128xf32>
    %577 = vector.broadcast %6 : vector<1x128xf32> to vector<8x128xf32>
    %578 = arith.addf %576, %577 : vector<8x128xf32>
    %cst_141 = arith.constant dense<0xFF800000> : vector<8xf32>
    %579 = vector.multi_reduction <maximumf>, %578, %cst_141 [1] : vector<8x128xf32> to vector<8xf32>
    %580 = vector.shape_cast %579 : vector<8xf32> to vector<8x1xf32>
    %581 = vector.broadcast %580 : vector<8x1xf32> to vector<8x128xf32>
    %582 = arith.subf %578, %581 : vector<8x128xf32>
    %583 = math.exp %582 : vector<8x128xf32>
    %cst_142 = arith.constant dense<0.000000e+00> : vector<8xf32>
    %584 = vector.multi_reduction <add>, %583, %cst_142 [1] : vector<8x128xf32> to vector<8xf32>
    %585 = vector.shape_cast %584 : vector<8xf32> to vector<8x1xf32>
    %586 = vector.broadcast %580 : vector<8x1xf32> to vector<8x128xf32>
    %587 = arith.cmpf oge, %578, %586 : vector<8x128xf32>
    %c128_i32_143 = arith.constant 128 : i32
    %588 = vector.broadcast %c128_i32_143 : i32 to vector<8x128xi32>
    %589 = arith.select %587, %7, %588 : vector<8x128xi1>, vector<8x128xi32>
    %cst_144 = arith.constant dense<2147483647> : vector<8xi32>
    %590 = vector.multi_reduction <minsi>, %589, %cst_144 [1] : vector<8x128xi32> to vector<8xi32>
    %591 = vector.shape_cast %590 : vector<8xi32> to vector<8x1xi32>
    %592 = math.log %585 : vector<8x1xf32>
    %cst_145 = arith.constant 0.000000e+00 : f32
    %593 = vector.broadcast %cst_145 : f32 to vector<8x1xf32>
    %594 = arith.subf %593, %592 : vector<8x1xf32>
    %c127_i32_146 = arith.constant 127 : i32
    %595 = vector.broadcast %c127_i32_146 : i32 to vector<8x1xi32>
    %596 = arith.cmpi ne, %591, %595 : vector<8x1xi32>
    %cst_147 = arith.constant 0.000000e+00 : f32
    %597 = vector.broadcast %cst_147 : f32 to vector<8x1xf32>
    %598 = arith.select %596, %594, %597 : vector<8x1xi1>, vector<8x1xf32>
    %599 = arith.addf %526, %598 : vector<8x1xf32>
    %c-1_i32_148 = arith.constant -1 : i32
    %600 = vector.broadcast %c-1_i32_148 : i32 to vector<8x1xi32>
    %601 = arith.select %596, %591, %600 : vector<8x1xi1>, vector<8x1xi32>
    %c7_i32 = arith.constant 7 : i32
    %602 = vector.broadcast %c7_i32 : i32 to vector<8x128xi32>
    %603 = arith.cmpi eq, %8, %602 : vector<8x128xi32>
    %604 = vector.shape_cast %601 : vector<8x1xi32> to vector<8x1xi32>
    %605 = vector.broadcast %604 : vector<8x1xi32> to vector<8x128xi32>
    %606 = arith.select %603, %605, %533 : vector<8x128xi1>, vector<8x128xi32>
    %c0_149 = arith.constant 0 : index
    %c0_150 = arith.constant 0 : index
    %607 = vector.load %arg11[%c0_149, %c0_150] : memref<8x128xi32, #tpu.memory_space<vmem>>, vector<8x128xi32>
    tpu.vector_store %arg11[%c0_149, %c0_150], %606 {strides = array<i32>} : memref<8x128xi32, #tpu.memory_space<vmem>>, vector<8x128xi32>,
    %608 = vector.shape_cast %599 : vector<8x1xf32> to vector<8x1xf32>
    %609 = vector.broadcast %608 : vector<8x1xf32> to vector<8x128xf32>
    %c0_151 = arith.constant 0 : index
    %c0_152 = arith.constant 0 : index
    %610 = vector.load %arg12[%c0_151, %c0_152] : memref<8x128xf32, #tpu.memory_space<vmem>>, vector<8x128xf32>
    tpu.vector_store %arg12[%c0_151, %c0_152], %609 {strides = array<i32>} : memref<8x128xf32, #tpu.memory_space<vmem>>, vector<8x128xf32>,
    return
  }
}

</mosaic_0001>

<bundles_post_ra>
// kernel: forward.1
= control target key start
LH: loop header
LB: loop body
LE: loop exit
PB: predicated region body
PF: predicated region fallthrough
CT: control target
= control target key end

     0   :  { %s2284_s0 = inlined_call_operand.vmem [shape: f32[8,256], index: 0, kind: input, shape index: {}]   ;;  %s2285_s1 = inlined_call_operand.vmem [shape: bf16[128,128], index: 1, kind: input, shape index: {}]   ;;  %s2286_s2 = inlined_call_operand.vmem [shape: bf16[32,128], index: 2, kind: input, shape index: {}]   ;;  %s2287_s3 = inlined_call_operand.vmem [shape: f32[1,128], index: 3, kind: input, shape index: {}]   ;;  %s2288_s4 = inlined_call_operand.vmem [shape: bf16[32,32], index: 4, kind: input, shape index: {}]   ;;  %s2289_s5 = inlined_call_operand.vmem [shape: f32[1,32], index: 5, kind: input, shape index: {}]   ;;  %s2290_s6 = inlined_call_operand.vmem [shape: f32[32,128], index: 6, kind: input, shape index: {}]   ;;  %s2291_s7 = inlined_call_operand.vmem [shape: f32[1,128], index: 7, kind: input, shape index: {}]   ;;  %s2292_s8 = inlined_call_operand.vmem [shape: f32[1,32], index: 8, kind: input, shape index: {}]   ;;  %s2293_s9 = inlined_call_operand.vmem [shape: f32[1,32], index: 9, kind: input, shape index: {}]   ;;  %s2294_s10 = inlined_call_operand.vmem [shape: f32[1,32], index: 10, kind: input, shape index: {}]   ;;  %s2295_s11 = inlined_call_operand.hbm [shape: s32[8,128], index: 11, kind: output, shape index: {0}]   ;;  %s2296_s12 = inlined_call_operand.vmem [shape: f32[8,128], index: 12, kind: output, shape index: {1}]  }
   0x1   :  { %v1575_v0 = vld [vmem:[%s2290_s6 + $0x18] sm:$0xff]  ;;  %v1580_v1 = vld [vmem:[%s2290_s6 + $0x10] sm:$0xff]  ;;  %v1586_v2 = vld [vmem:[%s2292_s8] ss:$0 sm:$0xff] }
   0x2   :  { %112 = vmatpush.msra.mxu3 %v1575_v0  ;;  %343 = vmatpush.msra.mxu0 %v1575_v0  ;;  %v1592_v3 = vld [vmem:[%s2290_s6 + $0x8] sm:$0xff]  ;;  %v1597_v4 = vld [vmem:[%s2284_s0] sm:$0xff] }
   0x3   :  { %v91_v5 = vadd.f32 %v1586_v2, %v1597_v4  ;;  %v1606_v6 = vld [vmem:[%s2290_s6] sm:$0xff] }
   0x4   :  { %113 = vmatpush.msra.mxu3 %v1580_v1  ;;  %344 = vmatpush.msra.mxu0 %v1580_v1 }
   0x5   :  { %18 = vsyncpa [#allocation3], 0  ;;  %v92_v7 = vmax.f32 %v91_v5, 0.0  ;;  %vm96_vm0 = vcmask 261120   ;;  %v1616_v8 = vld [vmem:[%s2291_s7] ss:$0 sm:$0xff]  ;;  %v73_v11 = vlaneseq }
   0x6   :  { %114 = vmatpush.msra.mxu3 %v1592_v3  ;;  %345 = vmatpush.msra.mxu0 %v1592_v3  ;;  %v1632_v17 = vld [vmem:[%s2285_s1 + $0x38] sm:$0xff]  ;;  %v1638_v18 = vld [vmem:[%s2285_s1 + $0x30] sm:$0xff]  ;;  %v1644_v19 = vld [vmem:[%s2285_s1 + $0x28] sm:$0xff]  ;;  %v1503_v38 = vmov 0.0   ;;  %s1504_s18 = smov 64   ;;  %s1505_s24 = smov 96  }
   0x7   :  { %v1622_v12 = vand.u32 127, %v73_v11  ;;  %237 = vmatpush.bf16.msra.mxu2 %v1632_v17  ;;  %v1650_v20 = vld [vmem:[%s2285_s1 + $0x20] sm:$0xff]  ;;  %v1656_v21 = vld [vmem:[%s2285_s1 + $0x18] sm:$0xff]  ;;  %v1662_v22 = vld [vmem:[%s2285_s1 + $0x10] sm:$0xff]  ;;  %s1285_s14 = sshll.u32 %s2295_s11, 4  ;;  %s1286_s14 = int_to_ptr.hbm [resolvable:$true] %s1285_s14 }
   0x8   :  { %115 = vmatpush.msra.mxu3 %v1606_v6  ;;  %346 = vmatpush.msra.mxu0 %v1606_v6  ;;  %v1668_v27 = vld [vmem:[%s2286_s2 + $0x8] sm:$0xff]  ;;  %v1681_v29 = vld [vmem:[%s2286_s2] sm:$0xff] }
   0x9   :  { %1299 = vmatmul.msk.f32.vlgmr.msra.gmra.mxu3 %vm96_vm0, %v92_v7  ;;  %182 = vmatpush.bf16.msra.mxu1 %v1668_v27  ;;  %v1674_v28 = vld [vmem:[%s2285_s1 + $0x8] sm:$0xff]  ;;  %v1686_v30 = vld [vmem:[%s2293_s9] ss:$0 sm:$0xff]  ;;  %vm75_vm3 = vcmp.eq.s32.totalorder %v1622_v12, 127  ;;  %vm150_vm9 = vcmp.eq.s32.totalorder %v1622_v12, 0  ;;  %vm381_vm10 = vcmp.eq.s32.totalorder %v1622_v12, 1 }
   0xa   :  { %404 = vmatpush.bf16.msrb.mxu0 %v1668_v27  ;;  %v1692_v31 = vld [vmem:[%s2285_s1] sm:$0xff]  ;;  %v160_v32 = vpack.c.bf16 %v1686_v30, %v1686_v30  ;;  %s1502_s1 = smov 32   ;;  %v1298_v39 = vsel %vm75_vm3, 1.0, %v1503_v38  ;;  %v1763_v5 = vld [vmem:[%s2288_s4 + $0x8] sm:$0xff] }
   0xb   :  { %238 = vmatpush.bf16.msra.mxu2 %v1638_v18  ;;  %v1396_v33 = vld [vmem:[%s2294_s10] ss:$0 sm:$0xff]  ;;  %v78_v41 = vpack.c.bf16 %v1298_v39, %v1298_v39  ;;  %307 = vmatpush.bf16.msrb.mxu3 %v1763_v5 }
   0xc   :  { %259 = vrot.lane.b32.xlu2 %v1396_v33, %s1502_s1  ;;  %v1748_v47 = vld [vmem:[%s2287_s3] ss:$0 sm:$0xff] }
   0xd   :  { %183 = vmatpush.bf16.msra.mxu1 %v1681_v29  ;;  %v1769_v7 = vld [vmem:[%s2288_s4] sm:$0xff] }
   0xe   :  { %405 = vmatpush.bf16.msrb.mxu0 %v1681_v29 }
   0xf   :  { %239 = vmatpush.bf16.msra.mxu2 %v1644_v19  ;;  %308 = vmatpush.bf16.msrb.mxu3 %v1769_v7 }
  0x10   :  { %1309 = vmatmul.msk.bf16.vlgmr.msra.gmra.mxu1 %vm96_vm0, %v160_v32 }
  0x11   :  { %411 = vmatpush.bf16.msrb.mxu1 %v1632_v17 }
  0x13   :  { %240 = vmatpush.bf16.msra.mxu2 %v1650_v20  ;;  %460 = vmatpush.bf16.msra.mxu3 %v1763_v5 }
  0x15   :  { %412 = vmatpush.bf16.msrb.mxu1 %v1638_v18 }
  0x17   :  { %241 = vmatpush.bf16.msra.mxu2 %v1656_v21  ;;  %461 = vmatpush.bf16.msra.mxu3 %v1769_v7 }
  0x19   :  { %413 = vmatpush.bf16.msrb.mxu1 %v1644_v19 }
  0x1b   :  { %242 = vmatpush.bf16.msra.mxu2 %v1662_v22 }
  0x1d   :  { %414 = vmatpush.bf16.msrb.mxu1 %v1650_v20 }
  0x1f   :  { %243 = vmatpush.bf16.msra.mxu2 %v1674_v28 }
  0x21   :  { %415 = vmatpush.bf16.msrb.mxu1 %v1656_v21 }
  0x23   :  { %244 = vmatpush.bf16.msra.mxu2 %v1692_v31 }
  0x25   :  { %416 = vmatpush.bf16.msrb.mxu1 %v1662_v22 }
  0x27   :  { %561 = vmatpush.bf16.msrb.mxu2 %v1632_v17 }
  0x29   :  { %417 = vmatpush.bf16.msrb.mxu1 %v1674_v28 }
  0x2b   :  { %562 = vmatpush.bf16.msrb.mxu2 %v1638_v18 }
  0x2d   :  { %418 = vmatpush.bf16.msrb.mxu1 %v1692_v31 }
  0x2f   :  { %563 = vmatpush.bf16.msrb.mxu2 %v1644_v19 }
  0x31   :  { %643 = vmatpush.msra.mxu1 %v1575_v0 }
  0x33   :  { %564 = vmatpush.bf16.msrb.mxu2 %v1650_v20  ;;  %644 = vmatpush.msra.mxu1 %v1580_v1 }
  0x35   :  { %645 = vmatpush.msra.mxu1 %v1592_v3 }
  0x37   :  { %565 = vmatpush.bf16.msrb.mxu2 %v1656_v21  ;;  %646 = vmatpush.msra.mxu1 %v1606_v6 }
  0x3b   :  { %566 = vmatpush.bf16.msrb.mxu2 %v1662_v22 }
  0x3f   :  { %567 = vmatpush.bf16.msrb.mxu2 %v1674_v28 }
  0x43   :  { %568 = vmatpush.bf16.msrb.mxu2 %v1692_v31 }
  0x66   :  { %v1753_v59 = vpop.permute.xlu2 %259 }
  0x8c   :  { %v117_v9 = vpop.f32.mrf.mxu3 }
  0x8d   :  { %v1619_v10 = vadd.f32 %v1616_v8, %v117_v9  ;;  %v185_v45 = vpop.f32.mrf.mxu1 }
  0x8f   :  { %120 = vmax.xlane.f32.xlu0 %v1619_v10 }
  0x95   :  { %v187_v46 = vpop.f32.mrf.mxu1 }
 0x102   :  { %v1624_v13 = vpop.xlane.xlu0 %120 }
 0x103   :  { %vm127_vm1 = vcmp.ge.f32.partialorder %v1619_v10, %v1624_v13 }
 0x104   :  { %v128_v14 = vsel %vm127_vm1, %v1622_v12, 128  ;;  %vm531_vm1 = vcmp.eq.s32.totalorder %v1622_v12, 2 }
 0x105   :  { %v130_v15 = vshra.s32 %v128_v14, 16  ;;  %v129_v23 = vand.u32 65535, %v128_v14 }
 0x107   :  { %v132_v16 = vcvt.s32.f32 %v130_v15  ;;  %v131_v25 = vcvt.s32.f32 %v129_v23 }
 0x109   :  { %133 = vmin.xlane.f32.xlu0 %v132_v16 }
 0x17c   :  { %v134_v24 = vpop.xlane.xlu0 %133 }
 0x17d   :  { %vm135_vm2 = vcmp.eq.f32.partialorder %v132_v16, %v134_v24  ;;  %v140_v34 = vcvt.f32.s32 %v134_v24  ;;  %v1781_v16 = vld [vmem:[%s2289_s5] ss:$0 sm:$0xff] }
 0x17e   :  { %v136_v26 = vsel %vm135_vm2, %v131_v25, inf }
 0x17f   :  { %137 = vmin.xlane.f32.xlu1 %v136_v26  ;;  %v141_v36 = vshll.u32 %v140_v34, 16 }
 0x1f2   :  { %v138_v35 = vpop.xlane.xlu1 %137 }
 0x1f3   :  { %v139_v37 = vcvt.f32.s32 %v138_v35 }
 0x1f5   :  { %v1720_v40 = vadd.s32 %v141_v36, %v139_v37 }
 0x1f7   :  { %vm146_vm4 = vcmp.ne.s32.totalorder %v1720_v40, 127  ;;  %vm152_vm5 = vcmp.eq.s32.totalorder %v1622_v12, %v1720_v40 }
 0x1f8   :  { %v1300_v42 = vsel %vm152_vm5, 1.0, %v1503_v38  ;;  %vm158_vm6 = vmpackc.low %vm146_vm4, %vm146_vm4 }
 0x1f9   :  { %v155_v43 = vpack.c.bf16 %v1300_v42, %v1300_v42 }
 0x1fb   :  { %v1733_v44 = vsel %vm158_vm6, %v155_v43, %v78_v41 }
 0x1fc   :  { %245 = vmatmul.bf16.vlgmr.msra.gmra.mxu2 %v1733_v44 }
 0x1fd   :  { %856 = vmatpush.bf16.msra.mxu2 %v1632_v17 }
 0x201   :  { %857 = vmatpush.bf16.msra.mxu2 %v1638_v18 }
 0x205   :  { %858 = vmatpush.bf16.msra.mxu2 %v1644_v19 }
 0x209   :  { %859 = vmatpush.bf16.msra.mxu2 %v1650_v20 }
 0x20d   :  { %860 = vmatpush.bf16.msra.mxu2 %v1656_v21 }
 0x211   :  { %861 = vmatpush.bf16.msra.mxu2 %v1662_v22 }
 0x215   :  { %862 = vmatpush.bf16.msra.mxu2 %v1674_v28 }
 0x219   :  { %863 = vmatpush.bf16.msra.mxu2 %v1692_v31 }
 0x27f   :  { %v246_v48 = vpop.f32.mrf.mxu2 }
 0x280   :  { %v247_v49 = vadd.f32 %v246_v48, %v185_v45 }
 0x282   :  { %v253_v50 = vadd.f32 %v1748_v47, %v247_v49 }
 0x284   :  { %1399 = vtanh.f32 %v253_v50  ;;  %v254_v53 = vmul.f32 0.5, %v253_v50 }
 0x286   :  { %1401 = vtanh.f32 %v254_v53 }
 0x287   :  { %v248_v51 = vpop.f32.mrf.mxu2 }
 0x28a   :  { %v1400_v52 = vpop.eup %1399 }
 0x28b   :  { %264 = vrot.lane.b32.xlu1 %v1400_v52, %s1504_s18 }
 0x28c   :  { %v1402_v54 = vpop.eup %1401 }
 0x28d   :  { %v256_v55 = vadd.f32 1.0, %v1402_v54 }
 0x28f   :  { %v257_v56 = vmul.f32 0.5, %v256_v55 }
 0x291   :  { %v262_v60 = vmul.f32 %v1753_v59, %v257_v56 }
 0x2fd   :  { %v265_v57 = vpop.permute.xlu1 %264 }
 0x2fe   :  { %v267_v58 = vmul.f32 %v265_v57, %v257_v56 }
 0x300   :  { %269 = vrot.lane.b32.xlu2 %v267_v58, %s1502_s1  ;;  %v149_v58 = vsel %vm146_vm4, %v1720_v40, 4294967295 }
 0x35a   :  { %v270_v61 = vpop.permute.xlu2 %269 }
 0x35b   :  { %v1756_v62 = vadd.f32 %v270_v61, %v262_v60  ;;  %v151_v61 = vsel %vm150_vm9, %v149_v58, 4294967295 }
 0x35d   :  { %1403 = vtanh.f32 %v1756_v62 }
 0x363   :  { %v1404_v63 = vpop.eup %1403 }
 0x364   :  { %275 = vrot.lane.b32.xlu0 %v1404_v63, %s1504_s18 }
 0x3d6   :  { %v276_v9 = vpop.permute.xlu0 %275 }
 0x3d7   :  { %v278_v11 = vmul.f32 %v276_v9, %v257_v56 }
 0x3d9   :  { %v279_v14 = vpack.c.bf16 %v278_v11, %v278_v11 }
 0x3db   :  { %284 = vrot.lane.b32.xlu2 %v279_v14, %s1502_s1 }
 0x435   :  { %v285_v15 = vpop.permute.xlu2 %284 }
 0x436   :  { %1350 = vmatmul.msk.bf16.vlgmr.msrb.gmra.mxu3 %vm96_vm0, %v285_v15 }
 0x437   :  { %554 = vmatpush.bf16.msrb.mxu3 %v1668_v27 }
 0x43b   :  { %555 = vmatpush.bf16.msrb.mxu3 %v1681_v29 }
 0x4b9   :  { %v310_v23 = vpop.f32.mrf.mxu3 }
 0x4ba   :  { %v311_v24 = vadd.f32 %v1781_v16, %v310_v23 }
 0x4bc   :  { %v1787_v25 = vsel %vm146_vm4, %v311_v24, %v1586_v2 }
 0x4bd   :  { %321 = vrot.lane.b32.xlu2 %v1787_v25, %s1502_s1 }
 0x4c1   :  { %v312_v26 = vpop.f32.mrf.mxu3 }
 0x517   :  { %v322_v32 = vpop.permute.xlu2 %321 }
 0x518   :  { %v324_v33 = vadd.f32 %v322_v32, %v1597_v4 }
 0x51a   :  { %v325_v34 = vmax.f32 %v324_v33, 0.0 }
 0x51c   :  { %327 = vrot.lane.b32.xlu2 %v325_v34, %s1505_s24 }
 0x524   :  { %315 = vrot.lane.b32.xlu2 %v1686_v30, %s1505_s24 }
 0x576   :  { %v328_v35 = vpop.permute.xlu2 %327 }
 0x577   :  { %1351 = vmatmul.msk.f32.vlgmr.msra.gmra.mxu0 %vm96_vm0, %v328_v35 }
 0x578   :  { %493 = vmatpush.msra.mxu0 %v1575_v0 }
 0x57a   :  { %494 = vmatpush.msra.mxu0 %v1580_v1 }
 0x57c   :  { %495 = vmatpush.msra.mxu0 %v1592_v3 }
 0x57e   :  { %496 = vmatpush.msra.mxu0 %v1606_v6  ;;  %v316_v37 = vpop.permute.xlu2 %315 }
 0x57f   :  { %v1806_v30 = vsel %vm146_vm4, %v278_v11, %v316_v37 }
 0x580   :  { %v391_v39 = vpack.c.bf16 %v1806_v30, %v1806_v30 }
 0x5f4   :  { %v348_v2 = vpop.f32.mrf.mxu0 }
 0x5f5   :  { %v1801_v36 = vadd.f32 %v1616_v8, %v348_v2 }
 0x5f7   :  { %351 = vmax.xlane.f32.xlu1 %v1801_v36 }
 0x610   :  { %393 = vrot.lane.b32.xlu1 %v391_v39, %s1502_s1 }
 0x66a   :  { %v1811_v41 = vpop.xlane.xlu1 %351 }
 0x66b   :  { %vm358_vm7 = vcmp.ge.f32.partialorder %v1801_v36, %v1811_v41 }
 0x66c   :  { %v359_v42 = vsel %vm358_vm7, %v1622_v12, 128 }
 0x66d   :  { %v361_v43 = vshra.s32 %v359_v42, 16  ;;  %v360_v48 = vand.u32 65535, %v359_v42  ;;  %v1851_v42 = vsel %vm146_vm4, %v1756_v62, %v1753_v59 }
 0x66f   :  { %v363_v45 = vcvt.s32.f32 %v361_v43  ;;  %v362_v50 = vcvt.s32.f32 %v360_v48 }
 0x671   :  { %364 = vmin.xlane.f32.xlu0 %v363_v45 }
 0x682   :  { %v394_v46 = vpop.permute.xlu1 %393 }
 0x683   :  { %1353 = vmatmul.msk.bf16.vlgmr.msrb.gmra.mxu0 %vm96_vm0, %v394_v46 }
 0x684   :  { %610 = vmatpush.bf16.msrb.mxu0 %v1763_v5 }
 0x688   :  { %611 = vmatpush.bf16.msrb.mxu0 %v1769_v7 }
 0x6e4   :  { %v365_v49 = vpop.xlane.xlu0 %364 }
 0x6e5   :  { %vm366_vm8 = vcmp.eq.f32.partialorder %v363_v45, %v365_v49  ;;  %v371_v54 = vcvt.f32.s32 %v365_v49 }
 0x6e6   :  { %v367_v51 = vsel %vm366_vm8, %v362_v50, inf  ;;  %vm681_vm8 = vcmp.eq.s32.totalorder %v1622_v12, 3 }
 0x6e7   :  { %368 = vmin.xlane.f32.xlu2 %v367_v51  ;;  %v372_v56 = vshll.u32 %v371_v54, 16 }
 0x700   :  { %v407_v52 = vpop.f32.mrf.mxu0 }
 0x708   :  { %v409_v53 = vpop.f32.mrf.mxu0 }
 0x75a   :  { %v369_v55 = vpop.xlane.xlu2 %368 }
 0x75b   :  { %v370_v57 = vcvt.f32.s32 %v369_v55 }
 0x75d   :  { %v1823_v60 = vadd.s32 %v372_v56, %v370_v57 }
 0x75f   :  { %vm377_vm11 = vcmp.ne.s32.totalorder %v1823_v60, 127  ;;  %vm383_vm12 = vcmp.eq.s32.totalorder %v1622_v12, %v1823_v60 }
 0x760   :  { %v380_v63 = vsel %vm377_vm11, %v1823_v60, 4294967295  ;;  %v1352_v9 = vsel %vm383_vm12, 1.0, %v1503_v38  ;;  %vm389_vm13 = vmpackc.low %vm377_vm11, %vm377_vm11 }
 0x761   :  { %v1833_v11 = vsel %vm381_vm10, %v380_v63, %v151_v61  ;;  %v386_v14 = vpack.c.bf16 %v1352_v9, %v1352_v9 }
 0x763   :  { %v1839_v15 = vsel %vm389_vm13, %v386_v14, %v1733_v44 }
 0x764   :  { %419 = vmatmul.bf16.vlgmr.msrb.gmra.mxu1 %v1839_v15 }
 0x765   :  { %760 = vmatpush.bf16.msrb.mxu1 %v1763_v5 }
 0x769   :  { %761 = vmatpush.bf16.msrb.mxu1 %v1769_v7 }
 0x7e1   :  { %v420_v23 = vpop.f32.mrf.mxu1 }
 0x7e2   :  { %v421_v24 = vadd.f32 %v420_v23, %v407_v52 }
 0x7e4   :  { %v424_v26 = vadd.f32 %v1748_v47, %v421_v24 }
 0x7e6   :  { %1405 = vtanh.f32 %v424_v26  ;;  %v425_v34 = vmul.f32 0.5, %v424_v26 }
 0x7e8   :  { %1407 = vtanh.f32 %v425_v34 }
 0x7e9   :  { %v422_v32 = vpop.f32.mrf.mxu1 }
 0x7ec   :  { %v1406_v33 = vpop.eup %1405 }
 0x7ed   :  { %432 = vrot.lane.b32.xlu0 %v1406_v33, %s1504_s18 }
 0x7ee   :  { %v1408_v35 = vpop.eup %1407 }
 0x7ef   :  { %v427_v44 = vadd.f32 1.0, %v1408_v35 }
 0x7f1   :  { %v428_v2 = vmul.f32 0.5, %v427_v44 }
 0x7f3   :  { %v430_v43 = vmul.f32 %v428_v2, %v1851_v42 }
 0x85f   :  { %v433_v37 = vpop.permute.xlu0 %432 }
 0x860   :  { %v435_v39 = vmul.f32 %v433_v37, %v428_v2 }
 0x862   :  { %437 = vrot.lane.b32.xlu2 %v435_v39, %s1502_s1 }
 0x8bc   :  { %v438_v45 = vpop.permute.xlu2 %437 }
 0x8bd   :  { %v1854_v46 = vadd.f32 %v438_v45, %v430_v43 }
 0x8bf   :  { %1409 = vtanh.f32 %v1854_v46 }
 0x8c5   :  { %v1410_v48 = vpop.eup %1409 }
 0x8c6   :  { %443 = vrot.lane.b32.xlu0 %v1410_v48, %s1504_s18 }
 0x938   :  { %v444_v49 = vpop.permute.xlu0 %443 }
 0x939   :  { %v446_v50 = vmul.f32 %v444_v49, %v428_v2 }
 0x93b   :  { %v447_v51 = vpack.c.bf16 %v446_v50, %v446_v50  ;;  %v1888_v63 = vsel %vm377_vm11, %v446_v50, %v1806_v30 }
 0x93c   :  { %v541_v9 = vpack.c.bf16 %v1888_v63, %v1888_v63 }
 0x93d   :  { %449 = vrot.lane.b32.xlu1 %v447_v51, %s1502_s1 }
 0x9af   :  { %v450_v52 = vpop.permute.xlu1 %449 }
 0x9b0   :  { %1354 = vmatmul.msk.bf16.vlgmr.msra.gmra.mxu3 %vm96_vm0, %v450_v52 }
 0x9b1   :  { %704 = vmatpush.bf16.msra.mxu3 %v1668_v27 }
 0x9b5   :  { %705 = vmatpush.bf16.msra.mxu3 %v1681_v29 }
 0xa33   :  { %v463_v59 = vpop.f32.mrf.mxu3 }
 0xa34   :  { %v464_v62 = vadd.f32 %v1781_v16, %v463_v59 }
 0xa36   :  { %v1866_v53 = vsel %vm377_vm11, %v464_v62, %v1787_v25 }
 0xa37   :  { %471 = vrot.lane.b32.xlu0 %v1866_v53, %s1504_s18 }
 0xa3b   :  { %v465_v54 = vpop.f32.mrf.mxu3 }
 0xaa9   :  { %v472_v55 = vpop.permute.xlu0 %471 }
 0xaaa   :  { %v474_v56 = vadd.f32 %v472_v55, %v1597_v4 }
 0xaac   :  { %v475_v57 = vmax.f32 %v474_v56, 0.0 }
 0xaae   :  { %477 = vrot.lane.b32.xlu1 %v475_v57, %s1504_s18 }
 0xb20   :  { %v478_v58 = vpop.permute.xlu1 %477 }
 0xb21   :  { %1355 = vmatmul.msk.f32.vlgmr.msra.gmra.mxu0 %vm96_vm0, %v478_v58 }
 0xb22   :  { %711 = vmatpush.bf16.msra.mxu0 %v1632_v17 }
 0xb26   :  { %712 = vmatpush.bf16.msra.mxu0 %v1638_v18 }
 0xb2a   :  { %713 = vmatpush.bf16.msra.mxu0 %v1644_v19 }
 0xb2e   :  { %714 = vmatpush.bf16.msra.mxu0 %v1650_v20 }
 0xb32   :  { %715 = vmatpush.bf16.msra.mxu0 %v1656_v21 }
 0xb36   :  { %716 = vmatpush.bf16.msra.mxu0 %v1662_v22 }
 0xb3a   :  { %717 = vmatpush.bf16.msra.mxu0 %v1674_v28 }
 0xb3e   :  { %718 = vmatpush.bf16.msra.mxu0 %v1692_v31 }
 0xb9e   :  { %v498_v25 = vpop.f32.mrf.mxu0 }
 0xb9f   :  { %v1882_v61 = vadd.f32 %v1616_v8, %v498_v25 }
 0xba1   :  { %501 = vmax.xlane.f32.xlu2 %v1882_v61 }
 0xbb9   :  { %543 = vrot.lane.b32.xlu2 %v541_v9, %s1502_s1 }
 0xc14   :  { %v1893_v14 = vpop.xlane.xlu2 %501 }
 0xc15   :  { %vm508_vm14 = vcmp.ge.f32.partialorder %v1882_v61, %v1893_v14 }
 0xc16   :  { %v509_v23 = vsel %vm508_vm14, %v1622_v12, 128 }
 0xc17   :  { %v511_v24 = vshra.s32 %v509_v23, 16  ;;  %v510_v30 = vand.u32 65535, %v509_v23 }
 0xc19   :  { %v513_v26 = vcvt.s32.f32 %v511_v24  ;;  %v512_v34 = vcvt.s32.f32 %v510_v30  ;;  %v1932_v24 = vsel %vm377_vm11, %v1854_v46, %v1851_v42 }
 0xc1b   :  { %514 = vmin.xlane.f32.xlu0 %v513_v26 }
 0xc1c   :  { %v544_v32 = vpop.permute.xlu2 %543 }
 0xc1d   :  { %1357 = vmatmul.msk.bf16.vlgmr.msrb.gmra.mxu3 %vm96_vm0, %v544_v32 }
 0xc1e   :  { %788 = vmatpush.msrb.mxu3 %v1575_v0 }
 0xc20   :  { %789 = vmatpush.msrb.mxu3 %v1580_v1 }
 0xc22   :  { %790 = vmatpush.msrb.mxu3 %v1592_v3 }
 0xc24   :  { %791 = vmatpush.msrb.mxu3 %v1606_v6 }
 0xc8e   :  { %v515_v33 = vpop.xlane.xlu0 %514 }
 0xc8f   :  { %vm516_vm15 = vcmp.eq.f32.partialorder %v513_v26, %v515_v33  ;;  %v521_v37 = vcvt.f32.s32 %v515_v33 }
 0xc90   :  { %v517_v35 = vsel %vm516_vm15, %v512_v34, inf  ;;  %vm826_vm15 = vcmp.eq.s32.totalorder %v1622_v12, 4 }
 0xc91   :  { %518 = vmin.xlane.f32.xlu1 %v517_v35  ;;  %v522_v43 = vshll.u32 %v521_v37, 16 }
 0xca0   :  { %v557_v44 = vpop.f32.mrf.mxu3 }
 0xca8   :  { %v559_v2 = vpop.f32.mrf.mxu3 }
 0xd04   :  { %v519_v39 = vpop.xlane.xlu1 %518 }
 0xd05   :  { %v520_v45 = vcvt.f32.s32 %v519_v39 }
 0xd07   :  { %v1903_v48 = vadd.s32 %v522_v43, %v520_v45 }
 0xd09   :  { %vm527_vm2 = vcmp.ne.s32.totalorder %v1903_v48, 127  ;;  %vm533_vm3 = vcmp.eq.s32.totalorder %v1622_v12, %v1903_v48 }
 0xd0a   :  { %v530_v49 = vsel %vm527_vm2, %v1903_v48, 4294967295  ;;  %v1356_v50 = vsel %vm533_vm3, 1.0, %v1503_v38  ;;  %vm539_vm5 = vmpackc.low %vm527_vm2, %vm527_vm2 }
 0xd0b   :  { %v1914_v51 = vsel %vm531_vm1, %v530_v49, %v1833_v11  ;;  %v536_v52 = vpack.c.bf16 %v1356_v50, %v1356_v50 }
 0xd0d   :  { %v1920_v59 = vsel %vm539_vm5, %v536_v52, %v1839_v15 }
 0xd0e   :  { %569 = vmatmul.bf16.vlgmr.msrb.gmra.mxu2 %v1920_v59 }
 0xd0f   :  { %1149 = vmatpush.bf16.msrb.mxu2 %v1668_v27 }
 0xd13   :  { %1150 = vmatpush.bf16.msrb.mxu2 %v1681_v29 }
 0xd91   :  { %v570_v62 = vpop.f32.mrf.mxu2 }
 0xd92   :  { %v571_v54 = vadd.f32 %v570_v62, %v557_v44 }
 0xd94   :  { %v574_v55 = vadd.f32 %v1748_v47, %v571_v54 }
 0xd96   :  { %1411 = vtanh.f32 %v574_v55  ;;  %v575_v57 = vmul.f32 0.5, %v574_v55 }
 0xd98   :  { %1413 = vtanh.f32 %v575_v57 }
 0xd99   :  { %v572_v11 = vpop.f32.mrf.mxu2 }
 0xd9c   :  { %v1412_v56 = vpop.eup %1411 }
 0xd9d   :  { %582 = vrot.lane.b32.xlu0 %v1412_v56, %s1504_s18 }
 0xd9e   :  { %v1414_v58 = vpop.eup %1413 }
 0xd9f   :  { %v577_v15 = vadd.f32 1.0, %v1414_v58 }
 0xda1   :  { %v578_v25 = vmul.f32 0.5, %v577_v15 }
 0xda3   :  { %v580_v26 = vmul.f32 %v578_v25, %v1932_v24 }
 0xe0f   :  { %v583_v9 = vpop.permute.xlu0 %582 }
 0xe10   :  { %v585_v23 = vmul.f32 %v583_v9, %v578_v25 }
 0xe12   :  { %587 = vrot.lane.b32.xlu1 %v585_v23, %s1502_s1 }
 0xe84   :  { %v588_v32 = vpop.permute.xlu1 %587 }
 0xe85   :  { %v1935_v30 = vadd.f32 %v588_v32, %v580_v26 }
 0xe87   :  { %1415 = vtanh.f32 %v1935_v30 }
 0xe8d   :  { %v1416_v33 = vpop.eup %1415 }
 0xe8e   :  { %593 = vrot.lane.b32.xlu0 %v1416_v33, %s1504_s18 }
 0xf00   :  { %v594_v34 = vpop.permute.xlu0 %593 }
 0xf01   :  { %v596_v35 = vmul.f32 %v594_v34, %v578_v25 }
 0xf03   :  { %v597_v44 = vpack.c.bf16 %v596_v35, %v596_v35 }
 0xf05   :  { %599 = vrot.lane.b32.xlu2 %v597_v44, %s1502_s1 }
 0xf5f   :  { %v600_v2 = vpop.permute.xlu2 %599 }
 0xf60   :  { %1358 = vmatmul.msk.bf16.vlgmr.msrb.gmra.mxu0 %vm96_vm0, %v600_v2 }
 0xf61   :  { %938 = vmatpush.msrb.mxu0 %v1575_v0 }
 0xf63   :  { %939 = vmatpush.msrb.mxu0 %v1580_v1 }
 0xf65   :  { %940 = vmatpush.msrb.mxu0 %v1592_v3 }
 0xf67   :  { %941 = vmatpush.msrb.mxu0 %v1606_v6 }
 0xfdd   :  { %v613_v42 = vpop.f32.mrf.mxu0 }
 0xfde   :  { %v614_v46 = vadd.f32 %v1781_v16, %v613_v42 }
 0xfe0   :  { %v1949_v37 = vsel %vm527_vm2, %v614_v46, %v1866_v53 }
 0xfe1   :  { %621 = vrot.lane.b32.xlu1 %v1949_v37, %s1505_s24 }
 0xfe5   :  { %v615_v39 = vpop.f32.mrf.mxu0 }
0x1053   :  { %v622_v43 = vpop.permute.xlu1 %621 }
0x1054   :  { %v624_v45 = vadd.f32 %v622_v43, %v1597_v4  ;;  %v1965_v4 = vsel %vm527_vm2, %v596_v35, %v1888_v63 }
0x1055   :  { %v691_v62 = vpack.c.bf16 %v1965_v4, %v1965_v4 }
0x1056   :  { %v625_v49 = vmax.f32 %v624_v45, 0.0 }
0x1058   :  { %627 = vrot.lane.b32.xlu0 %v625_v49, %s1502_s1 }
0x10ca   :  { %v628_v50 = vpop.permute.xlu0 %627 }
0x10cb   :  { %1359 = vmatmul.msk.f32.vlgmr.msra.gmra.mxu1 %vm96_vm0, %v628_v50 }
0x10cc   :  { %849 = vmatpush.bf16.msra.mxu1 %v1668_v27 }
0x10d0   :  { %850 = vmatpush.bf16.msra.mxu1 %v1681_v29 }
0x1148   :  { %v648_v52 = vpop.f32.mrf.mxu1 }
0x1149   :  { %v1959_v53 = vadd.f32 %v1616_v8, %v648_v52 }
0x114b   :  { %651 = vmax.xlane.f32.xlu2 %v1959_v53 }
0x1163   :  { %693 = vrot.lane.b32.xlu2 %v691_v62, %s1502_s1 }
0x11be   :  { %v1970_v54 = vpop.xlane.xlu2 %651 }
0x11bf   :  { %vm658_vm6 = vcmp.ge.f32.partialorder %v1959_v53, %v1970_v54 }
0x11c0   :  { %v659_v55 = vsel %vm658_vm6, %v1622_v12, 128 }
0x11c1   :  { %v661_v11 = vshra.s32 %v659_v55, 16  ;;  %v660_v63 = vand.u32 65535, %v659_v55 }
0x11c3   :  { %v663_v56 = vcvt.s32.f32 %v661_v11  ;;  %v662_v15 = vcvt.s32.f32 %v660_v63 }
0x11c5   :  { %664 = vmin.xlane.f32.xlu1 %v663_v56 }
0x11c6   :  { %v694_v57 = vpop.permute.xlu2 %693 }
0x11c7   :  { %1361 = vmatmul.msk.bf16.vlgmr.msra.gmra.mxu3 %vm96_vm0, %v694_v57  ;;  %v2007_v57 = vsel %vm527_vm2, %v1935_v30, %v1932_v24 }
0x11c8   :  { %905 = vmatpush.bf16.msra.mxu3 %v1763_v5 }
0x11cc   :  { %906 = vmatpush.bf16.msra.mxu3 %v1769_v7 }
0x1238   :  { %v665_v58 = vpop.xlane.xlu1 %664 }
0x1239   :  { %vm666_vm7 = vcmp.eq.f32.partialorder %v663_v56, %v665_v58  ;;  %v671_v26 = vcvt.f32.s32 %v665_v58 }
0x123a   :  { %v667_v25 = vsel %vm666_vm7, %v662_v15, inf }
0x123b   :  { %668 = vmin.xlane.f32.xlu0 %v667_v25  ;;  %v672_v33 = vshll.u32 %v671_v26, 16 }
0x124a   :  { %v707_v9 = vpop.f32.mrf.mxu3 }
0x1252   :  { %v709_v23 = vpop.f32.mrf.mxu3 }
0x12ae   :  { %v669_v32 = vpop.xlane.xlu0 %668 }
0x12af   :  { %v670_v34 = vcvt.f32.s32 %v669_v32 }
0x12b1   :  { %v1978_v35 = vadd.s32 %v672_v33, %v670_v34  ;;  %v2022_v33 = vld [vmem:[%s2284_s0 + $0x8] sm:$0xff] }
0x12b3   :  { %vm677_vm9 = vcmp.ne.s32.totalorder %v1978_v35, 127  ;;  %vm683_vm10 = vcmp.eq.s32.totalorder %v1622_v12, %v1978_v35 }
0x12b4   :  { %v680_v44 = vsel %vm677_vm9, %v1978_v35, 4294967295  ;;  %v1360_v2 = vsel %vm683_vm10, 1.0, %v1503_v38  ;;  %vm689_vm12 = vmpackc.low %vm677_vm9, %vm677_vm9 }
0x12b5   :  { %v1989_v42 = vsel %vm681_vm8, %v680_v44, %v1914_v51  ;;  %v686_v46 = vpack.c.bf16 %v1360_v2, %v1360_v2  ;;  %vm976_vm8 = vcmp.eq.s32.totalorder %v1622_v12, 5 }
0x12b7   :  { %v1995_v39 = vsel %vm689_vm12, %v686_v46, %v1920_v59 }
0x12b8   :  { %719 = vmatmul.bf16.vlgmr.msra.gmra.mxu0 %v1995_v39 }
0x12b9   :  { %1055 = vmatpush.bf16.msra.mxu0 %v1763_v5 }
0x12bd   :  { %1056 = vmatpush.bf16.msra.mxu0 %v1769_v7 }
0x1335   :  { %v720_v43 = vpop.f32.mrf.mxu0 }
0x1336   :  { %v721_v45 = vadd.f32 %v720_v43, %v707_v9 }
0x1338   :  { %v724_v49 = vadd.f32 %v1748_v47, %v721_v45 }
0x133a   :  { %1417 = vtanh.f32 %v724_v49  ;;  %v725_v52 = vmul.f32 0.5, %v724_v49 }
0x133c   :  { %1419 = vtanh.f32 %v725_v52 }
0x133d   :  { %v722_v51 = vpop.f32.mrf.mxu0 }
0x1340   :  { %v1418_v50 = vpop.eup %1417 }
0x1341   :  { %732 = vrot.lane.b32.xlu1 %v1418_v50, %s1504_s18 }
0x1342   :  { %v1420_v62 = vpop.eup %1419 }
0x1343   :  { %v727_v59 = vadd.f32 1.0, %v1420_v62 }
0x1345   :  { %v728_v55 = vmul.f32 0.5, %v727_v59 }
0x1347   :  { %v730_v63 = vmul.f32 %v728_v55, %v2007_v57 }
0x13b3   :  { %v733_v11 = vpop.permute.xlu1 %732 }
0x13b4   :  { %v735_v56 = vmul.f32 %v733_v11, %v728_v55 }
0x13b6   :  { %737 = vrot.lane.b32.xlu0 %v735_v56, %s1502_s1 }
0x1428   :  { %v738_v58 = vpop.permute.xlu0 %737 }
0x1429   :  { %v2010_v15 = vadd.f32 %v738_v58, %v730_v63 }
0x142b   :  { %1421 = vtanh.f32 %v2010_v15 }
0x1431   :  { %v1422_v25 = vpop.eup %1421 }
0x1432   :  { %743 = vrot.lane.b32.xlu2 %v1422_v25, %s1504_s18 }
0x148c   :  { %v744_v9 = vpop.permute.xlu2 %743 }
0x148d   :  { %v746_v23 = vmul.f32 %v744_v9, %v728_v55 }
0x148f   :  { %v747_v26 = vpack.c.bf16 %v746_v23, %v746_v23  ;;  %v2047_v46 = vsel %vm677_vm9, %v746_v23, %v1965_v4 }
0x1490   :  { %v836_v43 = vpack.c.bf16 %v2047_v46, %v2047_v46 }
0x1491   :  { %749 = vrot.lane.b32.xlu0 %v747_v26, %s1502_s1 }
0x1503   :  { %v750_v32 = vpop.permute.xlu0 %749 }
0x1504   :  { %1362 = vmatmul.msk.bf16.vlgmr.msrb.gmra.mxu1 %vm96_vm0, %v750_v32 }
0x1505   :  { %999 = vmatpush.bf16.msrb.mxu1 %v1668_v27 }
0x1509   :  { %1000 = vmatpush.bf16.msrb.mxu1 %v1681_v29 }
0x1581   :  { %v763_v24 = vpop.f32.mrf.mxu1 }
0x1582   :  { %v764_v30 = vadd.f32 %v1781_v16, %v763_v24 }
0x1584   :  { %v2027_v34 = vsel %vm677_vm9, %v764_v30, %v1949_v37 }
0x1585   :  { %v771_v44 = vadd.f32 %v2022_v33, %v2027_v34 }
0x1587   :  { %v772_v2 = vmax.f32 %v771_v44, 0.0 }
0x1589   :  { %v765_v27 = vpop.f32.mrf.mxu1  ;;  %1363 = vmatmul.msk.f32.vlgmr.msrb.gmra.mxu3 %vm96_vm0, %v772_v2 }
0x158a   :  { %1006 = vmatpush.bf16.msrb.mxu3 %v1632_v17 }
0x158e   :  { %1007 = vmatpush.bf16.msrb.mxu3 %v1638_v18 }
0x1592   :  { %1008 = vmatpush.bf16.msrb.mxu3 %v1644_v19 }
0x1596   :  { %1009 = vmatpush.bf16.msrb.mxu3 %v1650_v20 }
0x159a   :  { %1010 = vmatpush.bf16.msrb.mxu3 %v1656_v21 }
0x159e   :  { %1011 = vmatpush.bf16.msrb.mxu3 %v1662_v22 }
0x15a2   :  { %1012 = vmatpush.bf16.msrb.mxu3 %v1674_v28 }
0x15a6   :  { %1013 = vmatpush.bf16.msrb.mxu3 %v1692_v31 }
0x160c   :  { %v793_v29 = vpop.f32.mrf.mxu3 }
0x160d   :  { %v2041_v37 = vadd.f32 %v1616_v8, %v793_v29 }
0x160f   :  { %796 = vmax.xlane.f32.xlu1 %v2041_v37 }
0x1628   :  { %838 = vrot.lane.b32.xlu1 %v836_v43, %s1502_s1 }
0x1682   :  { %v2052_v45 = vpop.xlane.xlu1 %796 }
0x1683   :  { %vm803_vm13 = vcmp.ge.f32.partialorder %v2041_v37, %v2052_v45 }
0x1684   :  { %v804_v49 = vsel %vm803_vm13, %v1622_v12, 128 }
0x1685   :  { %v806_v51 = vshra.s32 %v804_v49, 16  ;;  %v805_v4 = vand.u32 65535, %v804_v49 }
0x1687   :  { %v808_v50 = vcvt.s32.f32 %v806_v51  ;;  %v807_v59 = vcvt.s32.f32 %v805_v4 }
0x1689   :  { %809 = vmin.xlane.f32.xlu2 %v808_v50 }
0x169a   :  { %v839_v52 = vpop.permute.xlu1 %838 }
0x169b   :  { %1365 = vmatmul.msk.bf16.vlgmr.msra.gmra.mxu1 %vm96_vm0, %v839_v52 }
0x169c   :  { %1088 = vmatpush.msra.mxu1 %v1575_v0 }
0x169e   :  { %1089 = vmatpush.msra.mxu1 %v1580_v1 }
0x16a0   :  { %1090 = vmatpush.msra.mxu1 %v1592_v3 }
0x16a2   :  { %1091 = vmatpush.msra.mxu1 %v1606_v6 }
0x16fc   :  { %v810_v62 = vpop.xlane.xlu2 %809 }
0x16fd   :  { %vm811_vm14 = vcmp.eq.f32.partialorder %v808_v50, %v810_v62  ;;  %v816_v63 = vcvt.f32.s32 %v810_v62 }
0x16fe   :  { %v812_v55 = vsel %vm811_vm14, %v807_v59, inf }
0x16ff   :  { %813 = vmin.xlane.f32.xlu0 %v812_v55  ;;  %v817_v25 = vshll.u32 %v816_v63, 16 }
0x1718   :  { %v852_v11 = vpop.f32.mrf.mxu1 }
0x1720   :  { %v854_v56 = vpop.f32.mrf.mxu1 }
0x1772   :  { %v814_v58 = vpop.xlane.xlu0 %813 }
0x1773   :  { %v815_v9 = vcvt.f32.s32 %v814_v58 }
0x1775   :  { %v2062_v23 = vadd.s32 %v817_v25, %v815_v9 }
0x1777   :  { %vm822_vm1 = vcmp.ne.s32.totalorder %v2062_v23, 127  ;;  %vm828_vm3 = vcmp.eq.s32.totalorder %v1622_v12, %v2062_v23 }
0x1778   :  { %v825_v26 = vsel %vm822_vm1, %v2062_v23, 4294967295  ;;  %v1364_v32 = vsel %vm828_vm3, 1.0, %v1503_v38  ;;  %vm834_vm5 = vmpackc.low %vm822_vm1, %vm822_vm1  ;;  %vm1126_vm3 = vcmp.eq.s32.totalorder %v1622_v12, 6 }
0x1779   :  { %v2073_v24 = vsel %vm826_vm15, %v825_v26, %v1989_v42  ;;  %v831_v30 = vpack.c.bf16 %v1364_v32, %v1364_v32 }
0x177b   :  { %v2079_v44 = vsel %vm834_vm5, %v831_v30, %v1995_v39 }
0x177c   :  { %864 = vmatmul.bf16.vlgmr.msra.gmra.mxu2 %v2079_v44 }
0x177d   :  { %1236 = vmatpush.msra.mxu2 %v1575_v0 }
0x177f   :  { %1237 = vmatpush.msra.mxu2 %v1580_v1 }
0x1781   :  { %1238 = vmatpush.msra.mxu2 %v1592_v3  ;;  %v2093_v3 = vsel %vm677_vm9, %v2010_v15, %v2007_v57 }
0x1783   :  { %1239 = vmatpush.msra.mxu2 %v1606_v6 }
0x17ff   :  { %v865_v42 = vpop.f32.mrf.mxu2 }
0x1800   :  { %v866_v2 = vadd.f32 %v865_v42, %v852_v11 }
0x1802   :  { %v869_v27 = vadd.f32 %v1748_v47, %v866_v2 }
0x1804   :  { %1423 = vtanh.f32 %v869_v27  ;;  %v870_v39 = vmul.f32 0.5, %v869_v27 }
0x1806   :  { %1425 = vtanh.f32 %v870_v39 }
0x1807   :  { %v867_v29 = vpop.f32.mrf.mxu2 }
0x180a   :  { %v1424_v43 = vpop.eup %1423 }
0x180b   :  { %877 = vrot.lane.b32.xlu2 %v1424_v43, %s1504_s18 }
0x180c   :  { %v1426_v49 = vpop.eup %1425 }
0x180d   :  { %v872_v51 = vadd.f32 1.0, %v1426_v49 }
0x180f   :  { %v873_v0 = vmul.f32 0.5, %v872_v51 }
0x1811   :  { %v875_v6 = vmul.f32 %v873_v0, %v2093_v3 }
0x1865   :  { %v878_v50 = vpop.permute.xlu2 %877 }
0x1866   :  { %v880_v1 = vmul.f32 %v878_v50, %v873_v0 }
0x1868   :  { %882 = vrot.lane.b32.xlu0 %v880_v1, %s1502_s1 }
0x18da   :  { %v883_v52 = vpop.permute.xlu0 %882 }
0x18db   :  { %v2096_v4 = vadd.f32 %v883_v52, %v875_v6 }
0x18dd   :  { %1427 = vtanh.f32 %v2096_v4 }
0x18e3   :  { %v1428_v62 = vpop.eup %1427 }
0x18e4   :  { %888 = vrot.lane.b32.xlu0 %v1428_v62, %s1504_s18 }
0x1956   :  { %v889_v59 = vpop.permute.xlu0 %888 }
0x1957   :  { %v891_v55 = vmul.f32 %v889_v59, %v873_v0 }
0x1959   :  { %v892_v11 = vpack.c.bf16 %v891_v55, %v891_v55 }
0x195b   :  { %894 = vrot.lane.b32.xlu2 %v892_v11, %s1502_s1 }
0x19b5   :  { %v895_v56 = vpop.permute.xlu2 %894 }
0x19b6   :  { %1366 = vmatmul.msk.bf16.vlgmr.msra.gmra.mxu3 %vm96_vm0, %v895_v56 }
0x1a39   :  { %v908_v57 = vpop.f32.mrf.mxu3 }
0x1a3a   :  { %v909_v15 = vadd.f32 %v1781_v16, %v908_v57 }
0x1a3c   :  { %v2106_v63 = vsel %vm822_vm1, %v909_v15, %v2027_v34 }
0x1a3d   :  { %916 = vrot.lane.b32.xlu1 %v2106_v63, %s1502_s1 }
0x1a41   :  { %v910_v58 = vpop.f32.mrf.mxu3 }
0x1aaf   :  { %v917_v25 = vpop.permute.xlu1 %916 }
0x1ab0   :  { %v919_v9 = vadd.f32 %v917_v25, %v2022_v33 }
0x1ab2   :  { %v920_v26 = vmax.f32 %v919_v9, 0.0 }
0x1ab4   :  { %922 = vrot.lane.b32.xlu0 %v920_v26, %s1505_s24 }
0x1b26   :  { %v923_v32 = vpop.permute.xlu0 %922 }
0x1b27   :  { %1367 = vmatmul.msk.f32.vlgmr.msrb.gmra.mxu0 %vm96_vm0, %v923_v32 }
0x1b28   :  { %1156 = vmatpush.bf16.msrb.mxu0 %v1632_v17  ;;  %v2128_v17 = vsel %vm822_vm1, %v891_v55, %v2047_v46 }
0x1b2c   :  { %1157 = vmatpush.bf16.msrb.mxu0 %v1638_v18  ;;  %v986_v18 = vpack.c.bf16 %v2128_v17, %v2128_v17 }
0x1b30   :  { %1158 = vmatpush.bf16.msrb.mxu0 %v1644_v19 }
0x1b34   :  { %1159 = vmatpush.bf16.msrb.mxu0 %v1650_v20 }
0x1b38   :  { %1160 = vmatpush.bf16.msrb.mxu0 %v1656_v21 }
0x1b3c   :  { %1161 = vmatpush.bf16.msrb.mxu0 %v1662_v22 }
0x1b40   :  { %1162 = vmatpush.bf16.msrb.mxu0 %v1674_v28 }
0x1b44   :  { %1163 = vmatpush.bf16.msrb.mxu0 %v1692_v31 }
0x1ba4   :  { %v943_v34 = vpop.f32.mrf.mxu0 }
0x1ba5   :  { %v2122_v30 = vadd.f32 %v1616_v8, %v943_v34 }
0x1ba7   :  { %946 = vmax.xlane.f32.xlu2 %v2122_v30 }
0x1bbf   :  { %988 = vrot.lane.b32.xlu2 %v986_v18, %s1502_s1 }
0x1c1a   :  { %v2133_v19 = vpop.xlane.xlu2 %946 }
0x1c1b   :  { %vm953_vm6 = vcmp.ge.f32.partialorder %v2122_v30, %v2133_v19 }
0x1c1c   :  { %v954_v8 = vsel %vm953_vm6, %v1622_v12, 128 }
0x1c1d   :  { %v956_v20 = vshra.s32 %v954_v8, 16  ;;  %v955_v28 = vand.u32 65535, %v954_v8 }
0x1c1f   :  { %v958_v21 = vcvt.s32.f32 %v956_v20  ;;  %v957_v46 = vcvt.s32.f32 %v955_v28 }
0x1c21   :  { %959 = vmin.xlane.f32.xlu1 %v958_v21 }
0x1c22   :  { %v989_v22 = vpop.permute.xlu2 %988 }
0x1c23   :  { %1369 = vmatmul.msk.bf16.vlgmr.msrb.gmra.mxu1 %vm96_vm0, %v989_v22 }
0x1c24   :  { %1205 = vmatpush.bf16.msrb.mxu1 %v1763_v5 }
0x1c28   :  { %1206 = vmatpush.bf16.msrb.mxu1 %v1769_v7 }
0x1c94   :  { %v960_v31 = vpop.xlane.xlu1 %959 }
0x1c95   :  { %vm961_vm7 = vcmp.eq.f32.partialorder %v958_v21, %v960_v31  ;;  %v966_v29 = vcvt.f32.s32 %v960_v31 }
0x1c96   :  { %v962_v42 = vsel %vm961_vm7, %v957_v46, inf }
0x1c97   :  { %963 = vmin.xlane.f32.xlu0 %v962_v42  ;;  %v967_v39 = vshll.u32 %v966_v29, 16 }
0x1ca0   :  { %v1002_v2 = vpop.f32.mrf.mxu1 }
0x1ca8   :  { %v1004_v27 = vpop.f32.mrf.mxu1 }
0x1d0a   :  { %v964_v43 = vpop.xlane.xlu0 %963 }
0x1d0b   :  { %v965_v49 = vcvt.f32.s32 %v964_v43 }
0x1d0d   :  { %v2141_v51 = vadd.s32 %v967_v39, %v965_v49 }
0x1d0f   :  { %vm972_vm10 = vcmp.ne.s32.totalorder %v2141_v51, 127  ;;  %vm978_vm12 = vcmp.eq.s32.totalorder %v1622_v12, %v2141_v51 }
0x1d10   :  { %v975_v5 = vsel %vm972_vm10, %v2141_v51, 4294967295  ;;  %v1368_v7 = vsel %vm978_vm12, 1.0, %v1503_v38  ;;  %vm984_vm13 = vmpackc.low %vm972_vm10, %vm972_vm10 }
0x1d11   :  { %v981_v0 = vpack.c.bf16 %v1368_v7, %v1368_v7  ;;  %v2152_v50 = vsel %vm976_vm8, %v975_v5, %v2073_v24 }
0x1d13   :  { %v2158_v1 = vsel %vm984_vm13, %v981_v0, %v2079_v44  ;;  %v2168_v44 = vsel %vm822_vm1, %v2096_v4, %v2093_v3 }
0x1d14   :  { %1014 = vmatmul.bf16.vlgmr.msrb.gmra.mxu3 %v2158_v1 }
0x1d97   :  { %v1015_v6 = vpop.f32.mrf.mxu3 }
0x1d98   :  { %v1016_v52 = vadd.f32 %v1015_v6, %v1002_v2 }
0x1d9a   :  { %v1019_v62 = vadd.f32 %v1748_v47, %v1016_v52 }
0x1d9c   :  { %1429 = vtanh.f32 %v1019_v62  ;;  %v1020_v24 = vmul.f32 0.5, %v1019_v62 }
0x1d9e   :  { %1431 = vtanh.f32 %v1020_v24 }
0x1d9f   :  { %v1017_v59 = vpop.f32.mrf.mxu3 }
0x1da2   :  { %v1430_v55 = vpop.eup %1429 }
0x1da3   :  { %1027 = vrot.lane.b32.xlu1 %v1430_v55, %s1504_s18 }
0x1da4   :  { %v1432_v11 = vpop.eup %1431 }
0x1da5   :  { %v1022_v56 = vadd.f32 1.0, %v1432_v11 }
0x1da7   :  { %v1023_v57 = vmul.f32 0.5, %v1022_v56 }
0x1da9   :  { %v1025_v47 = vmul.f32 %v1023_v57, %v2168_v44 }
0x1e15   :  { %v1028_v15 = vpop.permute.xlu1 %1027 }
0x1e16   :  { %v1030_v58 = vmul.f32 %v1028_v15, %v1023_v57 }
0x1e18   :  { %1032 = vrot.lane.b32.xlu0 %v1030_v58, %s1502_s1 }
0x1e8a   :  { %v1033_v25 = vpop.permute.xlu0 %1032 }
0x1e8b   :  { %v2171_v9 = vadd.f32 %v1033_v25, %v1025_v47 }
0x1e8d   :  { %1433 = vtanh.f32 %v2171_v9 }
0x1e93   :  { %v1434_v26 = vpop.eup %1433 }
0x1e94   :  { %1038 = vrot.lane.b32.xlu2 %v1434_v26, %s1504_s18 }
0x1eee   :  { %v1039_v32 = vpop.permute.xlu2 %1038 }
0x1eef   :  { %v1041_v34 = vmul.f32 %v1039_v32, %v1023_v57 }
0x1ef1   :  { %v1042_v18 = vpack.c.bf16 %v1041_v34, %v1041_v34  ;;  %v1063_v2 = vsel %vm972_vm10, %v1041_v34, %v2128_v17  ;;  %v1474_v34 = vld [vmem:[%s2287_s3] ss:$0 sm:$0xff] }
0x1ef2   :  { %v1136_v27 = vpack.c.bf16 %v1063_v2, %v1063_v2 }
0x1ef3   :  { %1044 = vrot.lane.b32.xlu1 %v1042_v18, %s1502_s1 }
0x1f65   :  { %v1045_v8 = vpop.permute.xlu1 %1044 }
0x1f66   :  { %1370 = vmatmul.msk.bf16.vlgmr.msra.gmra.mxu0 %vm96_vm0, %v1045_v8 }
0x1fe3   :  { %v1058_v3 = vpop.f32.mrf.mxu0 }
0x1fe4   :  { %v1059_v4 = vadd.f32 %v1781_v16, %v1058_v3  ;;  %v2191_v16 = vld [vmem:[%s2291_s7] ss:$0 sm:$0xff] }
0x1fe6   :  { %v2181_v20 = vsel %vm972_vm10, %v1059_v4, %v2106_v63 }
0x1fe7   :  { %1066 = vrot.lane.b32.xlu0 %v2181_v20, %s1504_s18 }
0x1feb   :  { %v1060_v21 = vpop.f32.mrf.mxu0 }
0x2059   :  { %v1067_v22 = vpop.permute.xlu0 %1066 }
0x205a   :  { %v1069_v28 = vadd.f32 %v1067_v22, %v2022_v33 }
0x205c   :  { %v1070_v31 = vmax.f32 %v1069_v28, 0.0  ;;  %v1064_v28 = vsel %vm972_vm10, %v2171_v9, %v2168_v44  ;;  %v1475_v44 = vld [vmem:[%s2289_s5] ss:$0 sm:$0xff]  ;;  %s1506_s5 = smov [#allocation2]  }
0x205d   :  { %s1283_s30 = sshll.u32 %s1506_s5, 4  ;;  %s1284_s30 = int_to_ptr.vmem [resolvable:$true] %s1283_s30 }
0x205e   :  { %1072 = vrot.lane.b32.xlu2 %v1070_v31, %s1504_s18 }
0x20b8   :  { %v1073_v46 = vpop.permute.xlu2 %1072 }
0x20b9   :  { %1371 = vmatmul.msk.f32.vlgmr.msra.gmra.mxu1 %vm96_vm0, %v1073_v46 }
0x2136   :  { %v1093_v42 = vpop.f32.mrf.mxu1 }
0x2137   :  { %v2194_v63 = vadd.f32 %v2191_v16, %v1093_v42 }
0x2139   :  { %1096 = vmax.xlane.f32.xlu1 %v2194_v63 }
0x2152   :  { %1138 = vrot.lane.b32.xlu1 %v1136_v27, %s1502_s1 }
0x21ac   :  { %v2201_v29 = vpop.xlane.xlu1 %1096 }
0x21ad   :  { %vm1103_vm14 = vcmp.ge.f32.partialorder %v2194_v63, %v2201_v29 }
0x21ae   :  { %v1104_v43 = vsel %vm1103_vm14, %v1622_v12, 128 }
0x21af   :  { %v1106_v39 = vshra.s32 %v1104_v43, 16  ;;  %v1105_v7 = vand.u32 65535, %v1104_v43 }
0x21b1   :  { %v1108_v49 = vcvt.s32.f32 %v1106_v39  ;;  %v1107_v6 = vcvt.s32.f32 %v1105_v7 }
0x21b3   :  { %1109 = vmin.xlane.f32.xlu0 %v1108_v49 }
0x21c4   :  { %v1139_v5 = vpop.permute.xlu1 %1138 }
0x21c5   :  { %1373 = vmatmul.msk.bf16.vlgmr.msrb.gmra.mxu2 %vm96_vm0, %v1139_v5 }
0x2226   :  { %v1110_v0 = vpop.xlane.xlu0 %1109 }
0x2227   :  { %vm1111_vm15 = vcmp.eq.f32.partialorder %v1108_v49, %v1110_v0  ;;  %v1116_v59 = vcvt.f32.s32 %v1110_v0 }
0x2228   :  { %v1112_v17 = vsel %vm1111_vm15, %v1107_v6, inf }
0x2229   :  { %1113 = vmin.xlane.f32.xlu2 %v1112_v17  ;;  %v1117_v24 = vshll.u32 %v1116_v59, 16 }
0x2248   :  { %v1152_v52 = vpop.f32.mrf.mxu2 }
0x2250   :  { %v1154_v62 = vpop.f32.mrf.mxu2 }
0x2251   :  { %v122_v62 = vsub.f32 %v1619_v10, %v1624_v13  ;;  %v353_v10 = vsub.f32 %v1801_v36, %v1811_v41 }
0x2253   :  { %v123_v59 = vmul.f32 1.442695, %v122_v62  ;;  %v354_v13 = vmul.f32 1.442695, %v353_v10 }
0x229c   :  { %v1114_v55 = vpop.xlane.xlu2 %1113 }
0x229d   :  { %v1115_v11 = vcvt.f32.s32 %v1114_v55  ;;  %v653_v55 = vsub.f32 %v1959_v53, %v1970_v54 }
0x229f   :  { %v2207_v56 = vadd.s32 %v1117_v24, %v1115_v11  ;;  %v654_v24 = vmul.f32 1.442695, %v653_v55 }
0x22a1   :  { %vm1122_vm5 = vcmp.ne.s32.totalorder %v2207_v56, 127  ;;  %vm1128_vm6 = vcmp.eq.s32.totalorder %v1622_v12, %v2207_v56 }
0x22a2   :  { %v1125_v57 = vsel %vm1122_vm5, %v2207_v56, 4294967295  ;;  %v1372_v15 = vsel %vm1128_vm6, 1.0, %v1503_v38  ;;  %vm1134_vm7 = vmpackc.low %vm1122_vm5, %vm1122_vm5 }
0x22a3   :  { %v1131_v58 = vpack.c.bf16 %v1372_v15, %v1372_v15  ;;  %v2218_v47 = vsel %vm1126_vm3, %v1125_v57, %v2152_v50 }
0x22a5   :  { %v1135_v25 = vsel %vm1134_vm7, %v1131_v58, %v2158_v1 }
0x22a6   :  { %1164 = vmatmul.bf16.vlgmr.msrb.gmra.mxu0 %v1135_v25 }
0x2323   :  { %v1165_v26 = vpop.f32.mrf.mxu0 }
0x2324   :  { %v1166_v32 = vadd.f32 %v1165_v26, %v1152_v52 }
0x2326   :  { %v1169_v18 = vadd.f32 %v1474_v34, %v1166_v32  ;;  %v503_v32 = vsub.f32 %v1882_v61, %v1893_v14 }
0x2328   :  { %1435 = vtanh.f32 %v1169_v18  ;;  %v1170_v50 = vmul.f32 0.5, %v1169_v18 }
0x232a   :  { %1437 = vtanh.f32 %v1170_v50 }
0x232b   :  { %v1167_v38 = vpop.f32.mrf.mxu0 }
0x232c   :  { %v504_v38 = vmul.f32 1.442695, %v503_v32 }
0x232e   :  { %v1436_v8 = vpop.eup %1435 }
0x232f   :  { %1177 = vrot.lane.b32.xlu0 %v1436_v8, %s1504_s18 }
0x2330   :  { %v1438_v3 = vpop.eup %1437 }
0x2331   :  { %v1172_v4 = vadd.f32 1.0, %v1438_v3 }
0x2333   :  { %v1173_v21 = vmul.f32 0.5, %v1172_v4 }
0x2335   :  { %v1175_v31 = vmul.f32 %v1173_v21, %v1064_v28 }
0x23a1   :  { %v1178_v22 = vpop.permute.xlu0 %1177 }
0x23a2   :  { %v1180_v1 = vmul.f32 %v1178_v22, %v1173_v21 }
0x23a4   :  { %1182 = vrot.lane.b32.xlu2 %v1180_v1, %s1502_s1 }
0x23fe   :  { %v1183_v46 = vpop.permute.xlu2 %1182 }
0x23ff   :  { %v1185_v42 = vadd.f32 %v1183_v46, %v1175_v31 }
0x2401   :  { %1439 = vtanh.f32 %v1185_v42 }
0x2402   :  { %1441 = vpow2.f32 %v123_v59 }
0x2403   :  { %1443 = vpow2.f32 %v654_v24 }
0x2407   :  { %v1440_v2 = vpop.eup %1439 }
0x2408   :  { %1188 = vrot.lane.b32.xlu0 %v1440_v2, %s1504_s18  ;;  %v1442_v11 = vpop.eup %1441 }
0x247a   :  { %v1189_v27 = vpop.permute.xlu0 %1188 }
0x247b   :  { %v1191_v43 = vmul.f32 %v1189_v27, %v1173_v21 }
0x247d   :  { %v1192_v39 = vpack.c.bf16 %v1191_v43, %v1191_v43 }
0x247f   :  { %1194 = vrot.lane.b32.xlu1 %v1192_v39, %s1502_s1 }
0x24f1   :  { %v1195_v49 = vpop.permute.xlu1 %1194 }
0x24f2   :  { %1374 = vmatmul.msk.bf16.vlgmr.msrb.gmra.mxu1 %vm96_vm0, %v1195_v49 }
0x256f   :  { %v1208_v5 = vpop.f32.mrf.mxu1 }
0x2570   :  { %v1209_v9 = vadd.f32 %v1475_v44, %v1208_v5 }
0x2572   :  { %v1212_v7 = vsel %vm1122_vm5, %v1209_v9, %v2181_v20  ;;  %v1098_v20 = vsub.f32 %v2194_v63, %v2201_v29  ;;  %v798_v63 = vsub.f32 %v2041_v37, %v2052_v45  ;;  %v948_v37 = vsub.f32 %v2122_v30, %v2133_v19 }
0x2573   :  { %1214 = vrot.lane.b32.xlu2 %v1212_v7, %s1505_s24 }
0x2574   :  { %v1099_v57 = vmul.f32 1.442695, %v1098_v20  ;;  %v799_v29 = vmul.f32 1.442695, %v798_v63  ;;  %v949_v50 = vmul.f32 1.442695, %v948_v37 }
0x2576   :  { %1445 = vpow2.f32 %v1099_v57 }
0x2577   :  { %v1210_v0 = vpop.f32.mrf.mxu1  ;;  %1447 = vpow2.f32 %v354_v13 }
0x2578   :  { %1449 = vpow2.f32 %v799_v29 }
0x25cd   :  { %v1215_v6 = vpop.permute.xlu2 %1214 }
0x25ce   :  { %v1217_v17 = vadd.f32 %v1215_v6, %v2022_v33  ;;  %v1444_v33 = vpop.eup %1443 }
0x25cf   :  { %v1446_v15 = vpop.eup %1445 }
0x25d0   :  { %v1218_v52 = vmax.f32 %v1217_v17, 0.0  ;;  %v1448_v25 = vpop.eup %1447 }
0x25d1   :  { %v1450_v26 = vpop.eup %1449 }
0x25d2   :  { %1220 = vrot.lane.b32.xlu0 %v1218_v52, %s1502_s1 }
0x25fc   :  { %125 = vadd.xlane.f32.xlu0 %v1442_v11 }
0x2604   :  { %656 = vadd.xlane.f32.xlu0 %v1444_v33 }
0x260c   :  { %1101 = vadd.xlane.f32.xlu0 %v1446_v15 }
0x2644   :  { %v1221_v58 = vpop.permute.xlu0 %1220 }
0x2645   :  { %1375 = vmatmul.msk.f32.vlgmr.msra.gmra.mxu2 %vm96_vm0, %v1221_v58 }
0x266f   :  { %v126_v1 = vpop.xlane.xlu0 %125 }
0x2677   :  { %v657_v30 = vpop.xlane.xlu0 %656 }
0x267f   :  { %v1102_v7 = vpop.xlane.xlu0 %1101 }
0x26c8   :  { %v1241_v53 = vpop.f32.mrf.mxu2 }
0x26c9   :  { %v1242_v54 = vadd.f32 %v2191_v16, %v1241_v53 }
0x26cb   :  { %1244 = vmax.xlane.f32.xlu1 %v1242_v54 }
0x26d3   :  { %356 = vadd.xlane.f32.xlu1 %v1448_v25 }
0x26db   :  { %801 = vadd.xlane.f32.xlu1 %v1450_v26 }
0x273e   :  { %v1245_v34 = vpop.xlane.xlu1 %1244 }
0x273f   :  { %v1246_v36 = vsub.f32 %v1242_v54, %v1245_v34  ;;  %vm1251_vm0 = vcmp.ge.f32.partialorder %v1242_v54, %v1245_v34 }
0x2740   :  { %v1252_v41 = vsel %vm1251_vm0, %v1622_v12, 128 }
0x2741   :  { %v1247_v16 = vmul.f32 1.442695, %v1246_v36  ;;  %v1254_v18 = vshra.s32 %v1252_v41, 16  ;;  %v1253_v14 = vand.u32 65535, %v1252_v41 }
0x2743   :  { %1451 = vpow2.f32 %v1247_v16  ;;  %v1256_v8 = vcvt.s32.f32 %v1254_v18  ;;  %v1255_v21 = vcvt.s32.f32 %v1253_v14 }
0x2744   :  { %1453 = vpow2.f32 %v504_v38 }
0x2745   :  { %1257 = vmin.xlane.f32.xlu2 %v1256_v8  ;;  %1455 = vpow2.f32 %v949_v50 }
0x2746   :  { %v357_v28 = vpop.xlane.xlu1 %356 }
0x2747   :  { %1457 = vlog2.f32 %v357_v28 }
0x2748   :  { %1459 = vlog2.f32 %v126_v1 }
0x2749   :  { %v1452_v45 = vpop.eup %1451 }
0x274a   :  { %1249 = vadd.xlane.f32.xlu1 %v1452_v45  ;;  %v1454_v3 = vpop.eup %1453 }
0x274b   :  { %v1456_v61 = vpop.eup %1455 }
0x274d   :  { %506 = vadd.xlane.f32.xlu2 %v1454_v3  ;;  %v1458_v19 = vpop.eup %1457 }
0x274e   :  { %v1460_v46 = vpop.eup %1459  ;;  %v802_v2 = vpop.xlane.xlu1 %801  ;;  %v375_v27 = vmul.f32 0.6931472, %v1458_v19 }
0x274f   :  { %v144_v39 = vmul.f32 0.6931472, %v1460_v46 }
0x2750   :  { %v376_v5 = vsub.f32 0.0, %v375_v27 }
0x2751   :  { %v145_v9 = vsub.f32 0.0, %v144_v39 }
0x2752   :  { %v378_v52 = vsel %vm377_vm11, %v376_v5, 0.0 }
0x2753   :  { %v147_v59 = vsel %vm146_vm4, %v145_v9, 0.0  ;;  %vm1274_vm4 = vcmp.eq.s32.totalorder %v1622_v12, 7 }
0x2754   :  { %v379_v11 = vadd.f32 %v378_v52, %v147_v59 }
0x2755   :  { %951 = vadd.xlane.f32.xlu2 %v1456_v61 }
0x27b8   :  { %v1258_v4 = vpop.xlane.xlu2 %1257 }
0x27b9   :  { %vm1259_vm8 = vcmp.eq.f32.partialorder %v1256_v8, %v1258_v4  ;;  %v1264_v63 = vcvt.f32.s32 %v1258_v4 }
0x27ba   :  { %v1260_v22 = vsel %vm1259_vm8, %v1255_v21, inf }
0x27bb   :  { %1261 = vmin.xlane.f32.xlu2 %v1260_v22  ;;  %v1265_v36 = vshll.u32 %v1264_v63, 16 }
0x27bd   :  { %v1250_v55 = vpop.xlane.xlu1 %1249 }
0x27c0   :  { %v507_v31 = vpop.xlane.xlu2 %506 }
0x27c1   :  { %1461 = vlog2.f32 %v507_v31 }
0x27c2   :  { %1463 = vlog2.f32 %v657_v30 }
0x27c3   :  { %1465 = vlog2.f32 %v802_v2 }
0x27c7   :  { %v1462_v42 = vpop.eup %1461 }
0x27c8   :  { %v952_v43 = vpop.xlane.xlu2 %951  ;;  %v525_v49 = vmul.f32 0.6931472, %v1462_v42  ;;  %v1464_v44 = vpop.eup %1463 }
0x27c9   :  { %1467 = vlog2.f32 %v952_v43  ;;  %v1466_v6 = vpop.eup %1465  ;;  %v675_v17 = vmul.f32 0.6931472, %v1464_v44 }
0x27ca   :  { %v526_v0 = vsub.f32 0.0, %v525_v49  ;;  %1469 = vlog2.f32 %v1102_v7  ;;  %v820_v57 = vmul.f32 0.6931472, %v1466_v6 }
0x27cb   :  { %v676_v20 = vsub.f32 0.0, %v675_v17  ;;  %1471 = vlog2.f32 %v1250_v55 }
0x27cc   :  { %v528_v24 = vsel %vm527_vm2, %v526_v0, 0.0  ;;  %v821_v10 = vsub.f32 0.0, %v820_v57 }
0x27cd   :  { %v529_v15 = vadd.f32 %v528_v24, %v379_v11  ;;  %v678_v60 = vsel %vm677_vm9, %v676_v20, 0.0 }
0x27ce   :  { %v823_v48 = vsel %vm822_vm1, %v821_v10, 0.0 }
0x27cf   :  { %v1468_v62 = vpop.eup %1467  ;;  %v679_v53 = vadd.f32 %v678_v60, %v529_v15 }
0x27d0   :  { %v970_v33 = vmul.f32 0.6931472, %v1468_v62  ;;  %v1470_v58 = vpop.eup %1469 }
0x27d1   :  { %v1120_v54 = vmul.f32 0.6931472, %v1470_v58  ;;  %v1472_v40 = vpop.eup %1471  ;;  %v824_v25 = vadd.f32 %v823_v48, %v679_v53 }
0x27d2   :  { %v971_v13 = vsub.f32 0.0, %v970_v33  ;;  %v1268_v32 = vmul.f32 0.6931472, %v1472_v40 }
0x27d3   :  { %v1121_v26 = vsub.f32 0.0, %v1120_v54 }
0x27d4   :  { %v973_v29 = vsel %vm972_vm10, %v971_v13, 0.0  ;;  %v1269_v18 = vsub.f32 0.0, %v1268_v32 }
0x27d5   :  { %v974_v41 = vadd.f32 %v973_v29, %v824_v25  ;;  %v1123_v23 = vsel %vm1122_vm5, %v1121_v26, 0.0 }
0x27d7   :  { %v1124_v51 = vadd.f32 %v1123_v23, %v974_v41 }
0x282e   :  { %v1262_v34 = vpop.xlane.xlu2 %1261 }
0x282f   :  { %v1263_v35 = vcvt.f32.s32 %v1262_v34 }
0x2831   :  { %v1266_v16 = vadd.s32 %v1265_v36, %v1263_v35 }
0x2833   :  { %vm1270_vm11 = vcmp.ne.s32.totalorder %v1266_v16, 127 }
0x2834   :  { %v1271_v38 = vsel %vm1270_vm11, %v1269_v18, 0.0  ;;  %v1273_v8 = vsel %vm1270_vm11, %v1266_v16, 4294967295 }
0x2835   :  { %v1272_v37 = vadd.f32 %v1271_v38, %v1124_v51  ;;  %v1275_v45 = vsel %vm1274_vm4, %v1273_v8, %v2218_v47 }
0x2836   :  { %1276 = vst [vmem:[#allocation2] sm:$0xff] %v1275_v45 }
0x2837   :  { %1277 = vst [vmem:[%s2296_s12] sm:$0xff] %v1272_v37  ;;  %1288 = dma.vmem_to_hbm [thread:$0]  %s1284_s30, 128, %s1286_s14, [#allocation3]  }
0x2838   :  { %1500 = dma.done.wait [#allocation3], 128  }
0x2839   :  { %1501 = vsyncadd [#allocation3], 4294967168 }
0x283a   :  { %1297 = vsyncpa [#allocation3], 1 }

</bundles_post_ra>
